<compile_context>
chip_gen: v6e
topology: v6e:2x2x1
jax: 0.10.0
libtpu: 0.0.40
codegen_flags: <defaults>
</compile_context>

<pallas_src>
import jax
import jax.numpy as jnp
from jax import lax
from jax.experimental import pallas as pl
from jax.experimental.pallas import tpu as pltpu

BN_EPS = 1e-5          # torch.nn.BatchNorm1d default eps
NORM_EPS = 1e-12       # torch.nn.functional.normalize default eps
SOFTMAX_MASK = -1e30   # lane mask for padded softmax columns
MATMUL_DTYPE = jnp.float32  # set to jnp.bfloat16 on v6e/v7x once batch is MXU-filling


def _round_up(x, m):
    return ((x + m - 1) // m) * m


def _vmem():
    return pl.BlockSpec(memory_space=pltpu.MemorySpace.VMEM)


# ----------------------------- fused kernel ---------------------------------

def make_dcmvc_kernel(view, batch, n_enc, n_dec, pad):
    """Fused forward for all views + shared cluster head.

    Operands: x_slab (view*batch, pad), w_slab (n_layers*(pad+8), pad).
    Output:   out    (view*batch, 3*pad) = [xr | z | c] per row block.
    Weight-slab layout per layer block (stride = pad+8 rows):
      rows [0:pad]  -> padded (in, out) weight,
      row  pad      -> BN gamma (LBR layers) or linear bias + -1e30 lane mask
                       (softmax layers),
      row  pad+1    -> BN beta (LBR layers).
    """
    stride = pad + 8
    n_view_layers = n_enc + n_dec

    def kernel(x_ref, w_ref, out_ref):
        def wmat(l):                        # (pad, pad) padded weight
            off = l * stride
            return w_ref[off:off + pad, :]

        def prow(l, r):                     # (1, pad) param row
            off = l * stride + pad + r
            return w_ref[off:off + 1, :]

        def matmul(h, l):
            return jnp.dot(h.astype(MATMUL_DTYPE), wmat(l).astype(MATMUL_DTYPE),
                           preferred_element_type=jnp.float32)

        def bn_relu(y, l):
            # torch BatchNorm1d, training mode (biased batch stats), two-pass
            # variance, folded to one per-feature scale/shift.  gamma/beta are
            # zero in padded lanes so padded lanes stay exactly 0.
            mean = jnp.mean(y, axis=0, keepdims=True)
            d = y - mean
            var = jnp.mean(d * d, axis=0, keepdims=True)
            scale = prow(l, 0) * lax.rsqrt(var + BN_EPS)
            shift = prow(l, 1) - mean * scale
            return jnp.maximum(y * scale + shift, 0.0)

        def lbr(h, l):                      # Linear -> BN -> ReLU
            return bn_relu(matmul(h, l), l)

        def lsm(h, l):                      # Linear -> Softmax(dim=1), exact
            y = matmul(h, l) + prow(l, 0)   # bias row carries -1e30 lane mask
            e = jnp.exp(y - jnp.max(y, axis=1, keepdims=True))
            return e / jnp.sum(e, axis=1, keepdims=True)

        zn_views = []
        for v in range(view):
            base = v * n_view_layers
            h = x_ref[v * batch:(v + 1) * batch, :]
            # encoder: (Linear->BN->ReLU) x (n_enc-1), then Linear->Softmax
            for i in range(n_enc - 1):
                h = lbr(h, base + i)
            z = lsm(h, base + n_enc - 1)
            # decoder: every layer (incl. the last) is Linear->BN->ReLU
            h = z
            for i in range(n_enc, n_view_layers):
                h = lbr(h, base + i)
            # lane-dense stores into the packed output slab
            out_ref[v * batch:(v + 1) * batch, 0:pad] = h          # xr
            out_ref[v * batch:(v + 1) * batch, pad:2 * pad] = z    # z
            # F.normalize(z): padded lanes are exactly 0 -> full-width sum exact
            sq = jnp.sum(z * z, axis=1, keepdims=True)
            zn_views.append(z * lax.rsqrt(jnp.maximum(sq, NORM_EPS * NORM_EPS)))

        # Shared cluster head, computed ONCE on the stacked views (one matmul
        # per layer over view*batch rows).  BatchNorm statistics are taken per
        # view to match torch, which invokes self.cluster() once per view.
        l_cl = view * n_view_layers
        y = matmul(jnp.concatenate(zn_views, axis=0), l_cl)
        g, b = prow(l_cl, 0), prow(l_cl, 1)
        acts = []
        for v in range(view):
            yv = y[v * batch:(v + 1) * batch, :]
            mean = jnp.mean(yv, axis=0, keepdims=True)
            d = yv - mean
            var = jnp.mean(d * d, axis=0, keepdims=True)
            scale = g * lax.rsqrt(var + BN_EPS)
            shift = b - mean * scale
            acts.append(jnp.maximum(yv * scale + shift, 0.0))
        c = lsm(jnp.concatenate(acts, axis=0), l_cl + 1)           # (view*batch, pad)
        out_ref[:, 2 * pad:3 * pad] = c

    return kernel


# ------------------------------ model wrapper --------------------------------

class DCMVCPallas:
    """Holds static config + the packed weight slab; apply() is jit-able."""

    def __init__(self, key, view, input_dim, embedding_dim, cluster_dim, n_clusters):
        self.view = view
        self.input_dim = list(input_dim)
        self.embedding_dim = list(embedding_dim)
        self.cluster_dim = cluster_dim
        self.n_clusters = n_clusters
        self.n_enc = len(embedding_dim)
        self.n_dec = len(embedding_dim)
        all_dims = self.input_dim + self.embedding_dim + [cluster_dim, n_clusters]
        self.pad = _round_up(max(all_dims), 128)
        self.n_layers = view * (self.n_enc + self.n_dec) + 2
        self.w_slab = self._init_slab(key)

    # PyTorch-style defaults: Linear W,b ~ U(-1/sqrt(fan_in), 1/sqrt(fan_in)),
    # BatchNorm1d gamma=1, beta=0.
    def _pack_block(self, key, d_in, d_out, *, softmax):
        pad = self.pad
        stride = pad + 8
        bound = float(d_in) ** -0.5
        kw, kb = jax.random.split(key)
        w = jax.random.uniform(kw, (d_in, d_out), jnp.float32, -bound, bound)
        blk = jnp.zeros((stride, pad), jnp.float32)
        blk = blk.at[:d_in, :d_out].set(w)
        if softmax:
            b = jax.random.uniform(kb, (d_out,), jnp.float32, -bound, bound)
            blk = blk.at[pad, :].set(SOFTMAX_MASK)   # mask padded softmax lanes
            blk = blk.at[pad, :d_out].set(b)
        else:
            # Linear bias dropped: exactly cancelled by training-mode BN mean
            # subtraction.  Row pad = gamma (ones), row pad+1 = beta (zeros).
            blk = blk.at[pad, :d_out].set(1.0)
        return blk

    def _init_slab(self, key):
        blocks = []
        for v in range(self.view):
            enc_dims = [self.input_dim[v]] + self.embedding_dim
            for i in range(len(enc_dims) - 1):
                key, sub = jax.random.split(key)
                blocks.append(self._pack_block(sub, enc_dims[i], enc_dims[i + 1],
                                               softmax=(i == len(enc_dims) - 2)))
            dec_dims = list(reversed(self.embedding_dim)) + [self.input_dim[v]]
            for i in range(len(dec_dims) - 1):
                key, sub = jax.random.split(key)
                blocks.append(self._pack_block(sub, dec_dims[i], dec_dims[i + 1],
                                               softmax=False))
        key, s1 = jax.random.split(key)
        blocks.append(self._pack_block(s1, self.embedding_dim[-1],
                                       self.cluster_dim, softmax=False))
        key, s2 = jax.random.split(key)
        blocks.append(self._pack_block(s2, self.cluster_dim,
                                       self.n_clusters, softmax=True))
        return jnp.concatenate(blocks, axis=0)   # (n_layers*(pad+8), pad)

    def apply(self, w_slab, xs):
        """Matches DCMVC.forward: returns (xrs, zs, cs) lists per view."""
        view, pad = self.view, self.pad
        batch = xs[0].shape[0]
        assert batch % 8 == 0, "batch must be a multiple of 8 (f32 sublanes)"

        # Pack both views into one lane-dense input slab (zero-padded lanes).
        x_slab = jnp.zeros((view * batch, pad), jnp.float32)
        for v in range(view):
            x_slab = x_slab.at[v * batch:(v + 1) * batch,
                               :self.input_dim[v]].set(xs[v].astype(jnp.float32))

        # Advisory cost estimate (all matmuls run at the padded width).
        n_view_layers = self.n_enc + self.n_dec
        mm_rows = view * n_view_layers * batch + 2 * view * batch
        flops = 2 * pad * pad * mm_rows
        n_bn_apps = view * (self.n_enc - 1 + self.n_dec) + view
        transcendentals = 2 * view * batch * pad + n_bn_apps * pad + view * batch
        bytes_accessed = 4 * (view * batch * pad + int(w_slab.size)
                              + view * batch * 3 * pad)

        out = pl.pallas_call(
            make_dcmvc_kernel(view, batch, self.n_enc, self.n_dec, pad),
            out_shape=jax.ShapeDtypeStruct((view * batch, 3 * pad), jnp.float32),
            in_specs=[_vmem(), _vmem()],
            out_specs=_vmem(),
            cost_estimate=pl.CostEstimate(flops=flops,
                                          transcendentals=transcendentals,
                                          bytes_accessed=bytes_accessed),
        )(x_slab, w_slab)

        # Slice the packed output slab back to natural per-view shapes (XLA side).
        d_lat = self.embedding_dim[-1]
        xrs, zs, cs = [], [], []
        for v in range(view):
            rows = out[v * batch:(v + 1) * batch]
            xrs.append(rows[:, 0:self.input_dim[v]])
            zs.append(rows[:, pad:pad + d_lat])
            cs.append(rows[:, 2 * pad:2 * pad + self.n_clusters])
        return xrs, zs, cs


# --------------------------------- main ---------------------------------------

if __name__ == "__main__":
    key = jax.random.PRNGKey(0)

    view = 2
    input_dim = [20, 24]
    embedding_dim = [32, 16, 8]
    cluster_dim = 16
    n_clusters = 4
    batch = 8   # demo size; scale to >=128 (v5e) / >=256 (v6e/v7x) to fill MXU M

    pkey, xkey = jax.random.split(key)
    model = DCMVCPallas(pkey, view, input_dim, embedding_dim,
                        cluster_dim, n_clusters)

    xs = []
    for v in range(view):
        xkey, sub = jax.random.split(xkey)
        xs.append(jax.random.normal(sub, (batch, input_dim[v]), jnp.float32))

    forward = jax.jit(model.apply)
    xrs, zs, cs = forward(model.w_slab, xs)
    jax.block_until_ready((xrs, zs, cs))

    assert all(xrs[v].shape == (batch, input_dim[v]) for v in range(view))
    assert all(zs[v].shape == (batch, embedding_dim[-1]) for v in range(view))
    assert all(cs[v].shape == (batch, n_clusters) for v in range(view))
    assert all(bool(jnp.all(jnp.isfinite(t))) for t in xrs + zs + cs)
    # softmax outputs (z and c) must be proper row distributions
    for t in zs + cs:
        assert bool(jnp.all(jnp.abs(jnp.sum(t, axis=1) - 1.0) < 1e-4))
        assert bool(jnp.all(t >= 0.0))

    print("KERNEL_OK")
</pallas_src>

<mosaic_0001>
module attributes {stable_mosaic.version = 11 : i64} {
  func.func @kernel(%arg0: memref<16x128xf32, #tpu.memory_space<vmem>>, %arg1: memref<1904x128xf32, #tpu.memory_space<vmem>>, %arg2: memref<16x384xf32, #tpu.memory_space<vmem>>) attributes {dimension_semantics = [], scalar_prefetch = 0 : i64, scratch_operands = 0 : i64, tpu.core_type = #tpu.core_type<tc>} {
    %c0 = arith.constant 0 : index
    %c0_0 = arith.constant 0 : index
    %0 = vector.load %arg0[%c0, %c0_0] : memref<16x128xf32, #tpu.memory_space<vmem>>, vector<8x128xf32>
    %c0_1 = arith.constant 0 : index
    %c0_2 = arith.constant 0 : index
    %1 = vector.load %arg1[%c0_1, %c0_2] : memref<1904x128xf32, #tpu.memory_space<vmem>>, vector<128x128xf32>
    %cst = arith.constant dense<0.000000e+00> : vector<8x128xf32>
    %2 = tpu.matmul %0, %1, %cst {dimension_numbers = #tpu.dot_dimension_numbers<[1], [0], [0], [1], [0, 0, 1, 1], [], []>} : vector<8x128xf32>, vector<128x128xf32>, vector<8x128xf32> -> vector<8x128xf32>
    %cst_3 = arith.constant dense<0.000000e+00> : vector<128xf32>
    %3 = vector.multi_reduction <add>, %2, %cst_3 [0] : vector<8x128xf32> to vector<128xf32>
    %4 = vector.shape_cast %3 : vector<128xf32> to vector<1x128xf32>
    %cst_4 = arith.constant 8.000000e+00 : f32
    %5 = vector.broadcast %cst_4 : f32 to vector<1x128xf32>
    %6 = arith.divf %4, %5 : vector<1x128xf32>
    %7 = vector.broadcast %6 : vector<1x128xf32> to vector<8x128xf32>
    %8 = arith.subf %2, %7 : vector<8x128xf32>
    %9 = arith.mulf %8, %8 : vector<8x128xf32>
    %cst_5 = arith.constant dense<0.000000e+00> : vector<128xf32>
    %10 = vector.multi_reduction <add>, %9, %cst_5 [0] : vector<8x128xf32> to vector<128xf32>
    %11 = vector.shape_cast %10 : vector<128xf32> to vector<1x128xf32>
    %cst_6 = arith.constant 8.000000e+00 : f32
    %12 = vector.broadcast %cst_6 : f32 to vector<1x128xf32>
    %13 = arith.divf %11, %12 : vector<1x128xf32>
    %c128 = arith.constant 128 : index
    %c0_7 = arith.constant 0 : index
    %14 = vector.load %arg1[%c128, %c0_7] : memref<1904x128xf32, #tpu.memory_space<vmem>>, vector<1x128xf32>
    %cst_8 = arith.constant 9.99999974E-6 : f32
    %15 = vector.broadcast %cst_8 : f32 to vector<1x128xf32>
    %16 = arith.addf %13, %15 : vector<1x128xf32>
    %17 = math.rsqrt %16 : vector<1x128xf32>
    %18 = arith.mulf %14, %17 : vector<1x128xf32>
    %c129 = arith.constant 129 : index
    %c0_9 = arith.constant 0 : index
    %19 = vector.load %arg1[%c129, %c0_9] : memref<1904x128xf32, #tpu.memory_space<vmem>>, vector<1x128xf32>
    %20 = arith.mulf %6, %18 : vector<1x128xf32>
    %21 = arith.subf %19, %20 : vector<1x128xf32>
    %22 = vector.broadcast %18 : vector<1x128xf32> to vector<8x128xf32>
    %23 = arith.mulf %2, %22 : vector<8x128xf32>
    %24 = vector.broadcast %21 : vector<1x128xf32> to vector<8x128xf32>
    %25 = arith.addf %23, %24 : vector<8x128xf32>
    %cst_10 = arith.constant 0.000000e+00 : f32
    %26 = vector.broadcast %cst_10 : f32 to vector<8x128xf32>
    %27 = arith.maximumf %25, %26 : vector<8x128xf32>
    %c136 = arith.constant 136 : index
    %c0_11 = arith.constant 0 : index
    %28 = vector.load %arg1[%c136, %c0_11] : memref<1904x128xf32, #tpu.memory_space<vmem>>, vector<128x128xf32>
    %cst_12 = arith.constant dense<0.000000e+00> : vector<8x128xf32>
    %29 = tpu.matmul %27, %28, %cst_12 {dimension_numbers = #tpu.dot_dimension_numbers<[1], [0], [0], [1], [0, 0, 1, 1], [], []>} : vector<8x128xf32>, vector<128x128xf32>, vector<8x128xf32> -> vector<8x128xf32>
    %cst_13 = arith.constant dense<0.000000e+00> : vector<128xf32>
    %30 = vector.multi_reduction <add>, %29, %cst_13 [0] : vector<8x128xf32> to vector<128xf32>
    %31 = vector.shape_cast %30 : vector<128xf32> to vector<1x128xf32>
    %cst_14 = arith.constant 8.000000e+00 : f32
    %32 = vector.broadcast %cst_14 : f32 to vector<1x128xf32>
    %33 = arith.divf %31, %32 : vector<1x128xf32>
    %34 = vector.broadcast %33 : vector<1x128xf32> to vector<8x128xf32>
    %35 = arith.subf %29, %34 : vector<8x128xf32>
    %36 = arith.mulf %35, %35 : vector<8x128xf32>
    %cst_15 = arith.constant dense<0.000000e+00> : vector<128xf32>
    %37 = vector.multi_reduction <add>, %36, %cst_15 [0] : vector<8x128xf32> to vector<128xf32>
    %38 = vector.shape_cast %37 : vector<128xf32> to vector<1x128xf32>
    %cst_16 = arith.constant 8.000000e+00 : f32
    %39 = vector.broadcast %cst_16 : f32 to vector<1x128xf32>
    %40 = arith.divf %38, %39 : vector<1x128xf32>
    %c264 = arith.constant 264 : index
    %c0_17 = arith.constant 0 : index
    %41 = vector.load %arg1[%c264, %c0_17] : memref<1904x128xf32, #tpu.memory_space<vmem>>, vector<1x128xf32>
    %cst_18 = arith.constant 9.99999974E-6 : f32
    %42 = vector.broadcast %cst_18 : f32 to vector<1x128xf32>
    %43 = arith.addf %40, %42 : vector<1x128xf32>
    %44 = math.rsqrt %43 : vector<1x128xf32>
    %45 = arith.mulf %41, %44 : vector<1x128xf32>
    %c265 = arith.constant 265 : index
    %c0_19 = arith.constant 0 : index
    %46 = vector.load %arg1[%c265, %c0_19] : memref<1904x128xf32, #tpu.memory_space<vmem>>, vector<1x128xf32>
    %47 = arith.mulf %33, %45 : vector<1x128xf32>
    %48 = arith.subf %46, %47 : vector<1x128xf32>
    %49 = vector.broadcast %45 : vector<1x128xf32> to vector<8x128xf32>
    %50 = arith.mulf %29, %49 : vector<8x128xf32>
    %51 = vector.broadcast %48 : vector<1x128xf32> to vector<8x128xf32>
    %52 = arith.addf %50, %51 : vector<8x128xf32>
    %cst_20 = arith.constant 0.000000e+00 : f32
    %53 = vector.broadcast %cst_20 : f32 to vector<8x128xf32>
    %54 = arith.maximumf %52, %53 : vector<8x128xf32>
    %c272 = arith.constant 272 : index
    %c0_21 = arith.constant 0 : index
    %55 = vector.load %arg1[%c272, %c0_21] : memref<1904x128xf32, #tpu.memory_space<vmem>>, vector<128x128xf32>
    %cst_22 = arith.constant dense<0.000000e+00> : vector<8x128xf32>
    %56 = tpu.matmul %54, %55, %cst_22 {dimension_numbers = #tpu.dot_dimension_numbers<[1], [0], [0], [1], [0, 0, 1, 1], [], []>} : vector<8x128xf32>, vector<128x128xf32>, vector<8x128xf32> -> vector<8x128xf32>
    %c400 = arith.constant 400 : index
    %c0_23 = arith.constant 0 : index
    %57 = vector.load %arg1[%c400, %c0_23] : memref<1904x128xf32, #tpu.memory_space<vmem>>, vector<1x128xf32>
    %58 = vector.broadcast %57 : vector<1x128xf32> to vector<8x128xf32>
    %59 = arith.addf %56, %58 : vector<8x128xf32>
    %cst_24 = arith.constant dense<0xFF800000> : vector<8xf32>
    %60 = vector.multi_reduction <maximumf>, %59, %cst_24 [1] : vector<8x128xf32> to vector<8xf32>
    %61 = vector.shape_cast %60 : vector<8xf32> to vector<8x1xf32>
    %62 = vector.broadcast %61 : vector<8x1xf32> to vector<8x128xf32>
    %63 = arith.subf %59, %62 : vector<8x128xf32>
    %64 = math.exp %63 : vector<8x128xf32>
    %cst_25 = arith.constant dense<0.000000e+00> : vector<8xf32>
    %65 = vector.multi_reduction <add>, %64, %cst_25 [1] : vector<8x128xf32> to vector<8xf32>
    %66 = vector.shape_cast %65 : vector<8xf32> to vector<8x1xf32>
    %67 = vector.broadcast %66 : vector<8x1xf32> to vector<8x128xf32>
    %68 = arith.divf %64, %67 : vector<8x128xf32>
    %c408 = arith.constant 408 : index
    %c0_26 = arith.constant 0 : index
    %69 = vector.load %arg1[%c408, %c0_26] : memref<1904x128xf32, #tpu.memory_space<vmem>>, vector<128x128xf32>
    %cst_27 = arith.constant dense<0.000000e+00> : vector<8x128xf32>
    %70 = tpu.matmul %68, %69, %cst_27 {dimension_numbers = #tpu.dot_dimension_numbers<[1], [0], [0], [1], [0, 0, 1, 1], [], []>} : vector<8x128xf32>, vector<128x128xf32>, vector<8x128xf32> -> vector<8x128xf32>
    %cst_28 = arith.constant dense<0.000000e+00> : vector<128xf32>
    %71 = vector.multi_reduction <add>, %70, %cst_28 [0] : vector<8x128xf32> to vector<128xf32>
    %72 = vector.shape_cast %71 : vector<128xf32> to vector<1x128xf32>
    %cst_29 = arith.constant 8.000000e+00 : f32
    %73 = vector.broadcast %cst_29 : f32 to vector<1x128xf32>
    %74 = arith.divf %72, %73 : vector<1x128xf32>
    %75 = vector.broadcast %74 : vector<1x128xf32> to vector<8x128xf32>
    %76 = arith.subf %70, %75 : vector<8x128xf32>
    %77 = arith.mulf %76, %76 : vector<8x128xf32>
    %cst_30 = arith.constant dense<0.000000e+00> : vector<128xf32>
    %78 = vector.multi_reduction <add>, %77, %cst_30 [0] : vector<8x128xf32> to vector<128xf32>
    %79 = vector.shape_cast %78 : vector<128xf32> to vector<1x128xf32>
    %cst_31 = arith.constant 8.000000e+00 : f32
    %80 = vector.broadcast %cst_31 : f32 to vector<1x128xf32>
    %81 = arith.divf %79, %80 : vector<1x128xf32>
    %c536 = arith.constant 536 : index
    %c0_32 = arith.constant 0 : index
    %82 = vector.load %arg1[%c536, %c0_32] : memref<1904x128xf32, #tpu.memory_space<vmem>>, vector<1x128xf32>
    %cst_33 = arith.constant 9.99999974E-6 : f32
    %83 = vector.broadcast %cst_33 : f32 to vector<1x128xf32>
    %84 = arith.addf %81, %83 : vector<1x128xf32>
    %85 = math.rsqrt %84 : vector<1x128xf32>
    %86 = arith.mulf %82, %85 : vector<1x128xf32>
    %c537 = arith.constant 537 : index
    %c0_34 = arith.constant 0 : index
    %87 = vector.load %arg1[%c537, %c0_34] : memref<1904x128xf32, #tpu.memory_space<vmem>>, vector<1x128xf32>
    %88 = arith.mulf %74, %86 : vector<1x128xf32>
    %89 = arith.subf %87, %88 : vector<1x128xf32>
    %90 = vector.broadcast %86 : vector<1x128xf32> to vector<8x128xf32>
    %91 = arith.mulf %70, %90 : vector<8x128xf32>
    %92 = vector.broadcast %89 : vector<1x128xf32> to vector<8x128xf32>
    %93 = arith.addf %91, %92 : vector<8x128xf32>
    %cst_35 = arith.constant 0.000000e+00 : f32
    %94 = vector.broadcast %cst_35 : f32 to vector<8x128xf32>
    %95 = arith.maximumf %93, %94 : vector<8x128xf32>
    %c544 = arith.constant 544 : index
    %c0_36 = arith.constant 0 : index
    %96 = vector.load %arg1[%c544, %c0_36] : memref<1904x128xf32, #tpu.memory_space<vmem>>, vector<128x128xf32>
    %cst_37 = arith.constant dense<0.000000e+00> : vector<8x128xf32>
    %97 = tpu.matmul %95, %96, %cst_37 {dimension_numbers = #tpu.dot_dimension_numbers<[1], [0], [0], [1], [0, 0, 1, 1], [], []>} : vector<8x128xf32>, vector<128x128xf32>, vector<8x128xf32> -> vector<8x128xf32>
    %cst_38 = arith.constant dense<0.000000e+00> : vector<128xf32>
    %98 = vector.multi_reduction <add>, %97, %cst_38 [0] : vector<8x128xf32> to vector<128xf32>
    %99 = vector.shape_cast %98 : vector<128xf32> to vector<1x128xf32>
    %cst_39 = arith.constant 8.000000e+00 : f32
    %100 = vector.broadcast %cst_39 : f32 to vector<1x128xf32>
    %101 = arith.divf %99, %100 : vector<1x128xf32>
    %102 = vector.broadcast %101 : vector<1x128xf32> to vector<8x128xf32>
    %103 = arith.subf %97, %102 : vector<8x128xf32>
    %104 = arith.mulf %103, %103 : vector<8x128xf32>
    %cst_40 = arith.constant dense<0.000000e+00> : vector<128xf32>
    %105 = vector.multi_reduction <add>, %104, %cst_40 [0] : vector<8x128xf32> to vector<128xf32>
    %106 = vector.shape_cast %105 : vector<128xf32> to vector<1x128xf32>
    %cst_41 = arith.constant 8.000000e+00 : f32
    %107 = vector.broadcast %cst_41 : f32 to vector<1x128xf32>
    %108 = arith.divf %106, %107 : vector<1x128xf32>
    %c672 = arith.constant 672 : index
    %c0_42 = arith.constant 0 : index
    %109 = vector.load %arg1[%c672, %c0_42] : memref<1904x128xf32, #tpu.memory_space<vmem>>, vector<1x128xf32>
    %cst_43 = arith.constant 9.99999974E-6 : f32
    %110 = vector.broadcast %cst_43 : f32 to vector<1x128xf32>
    %111 = arith.addf %108, %110 : vector<1x128xf32>
    %112 = math.rsqrt %111 : vector<1x128xf32>
    %113 = arith.mulf %109, %112 : vector<1x128xf32>
    %c673 = arith.constant 673 : index
    %c0_44 = arith.constant 0 : index
    %114 = vector.load %arg1[%c673, %c0_44] : memref<1904x128xf32, #tpu.memory_space<vmem>>, vector<1x128xf32>
    %115 = arith.mulf %101, %113 : vector<1x128xf32>
    %116 = arith.subf %114, %115 : vector<1x128xf32>
    %117 = vector.broadcast %113 : vector<1x128xf32> to vector<8x128xf32>
    %118 = arith.mulf %97, %117 : vector<8x128xf32>
    %119 = vector.broadcast %116 : vector<1x128xf32> to vector<8x128xf32>
    %120 = arith.addf %118, %119 : vector<8x128xf32>
    %cst_45 = arith.constant 0.000000e+00 : f32
    %121 = vector.broadcast %cst_45 : f32 to vector<8x128xf32>
    %122 = arith.maximumf %120, %121 : vector<8x128xf32>
    %c680 = arith.constant 680 : index
    %c0_46 = arith.constant 0 : index
    %123 = vector.load %arg1[%c680, %c0_46] : memref<1904x128xf32, #tpu.memory_space<vmem>>, vector<128x128xf32>
    %cst_47 = arith.constant dense<0.000000e+00> : vector<8x128xf32>
    %124 = tpu.matmul %122, %123, %cst_47 {dimension_numbers = #tpu.dot_dimension_numbers<[1], [0], [0], [1], [0, 0, 1, 1], [], []>} : vector<8x128xf32>, vector<128x128xf32>, vector<8x128xf32> -> vector<8x128xf32>
    %cst_48 = arith.constant dense<0.000000e+00> : vector<128xf32>
    %125 = vector.multi_reduction <add>, %124, %cst_48 [0] : vector<8x128xf32> to vector<128xf32>
    %126 = vector.shape_cast %125 : vector<128xf32> to vector<1x128xf32>
    %cst_49 = arith.constant 8.000000e+00 : f32
    %127 = vector.broadcast %cst_49 : f32 to vector<1x128xf32>
    %128 = arith.divf %126, %127 : vector<1x128xf32>
    %129 = vector.broadcast %128 : vector<1x128xf32> to vector<8x128xf32>
    %130 = arith.subf %124, %129 : vector<8x128xf32>
    %131 = arith.mulf %130, %130 : vector<8x128xf32>
    %cst_50 = arith.constant dense<0.000000e+00> : vector<128xf32>
    %132 = vector.multi_reduction <add>, %131, %cst_50 [0] : vector<8x128xf32> to vector<128xf32>
    %133 = vector.shape_cast %132 : vector<128xf32> to vector<1x128xf32>
    %cst_51 = arith.constant 8.000000e+00 : f32
    %134 = vector.broadcast %cst_51 : f32 to vector<1x128xf32>
    %135 = arith.divf %133, %134 : vector<1x128xf32>
    %c808 = arith.constant 808 : index
    %c0_52 = arith.constant 0 : index
    %136 = vector.load %arg1[%c808, %c0_52] : memref<1904x128xf32, #tpu.memory_space<vmem>>, vector<1x128xf32>
    %cst_53 = arith.constant 9.99999974E-6 : f32
    %137 = vector.broadcast %cst_53 : f32 to vector<1x128xf32>
    %138 = arith.addf %135, %137 : vector<1x128xf32>
    %139 = math.rsqrt %138 : vector<1x128xf32>
    %140 = arith.mulf %136, %139 : vector<1x128xf32>
    %c809 = arith.constant 809 : index
    %c0_54 = arith.constant 0 : index
    %141 = vector.load %arg1[%c809, %c0_54] : memref<1904x128xf32, #tpu.memory_space<vmem>>, vector<1x128xf32>
    %142 = arith.mulf %128, %140 : vector<1x128xf32>
    %143 = arith.subf %141, %142 : vector<1x128xf32>
    %144 = vector.broadcast %140 : vector<1x128xf32> to vector<8x128xf32>
    %145 = arith.mulf %124, %144 : vector<8x128xf32>
    %146 = vector.broadcast %143 : vector<1x128xf32> to vector<8x128xf32>
    %147 = arith.addf %145, %146 : vector<8x128xf32>
    %cst_55 = arith.constant 0.000000e+00 : f32
    %148 = vector.broadcast %cst_55 : f32 to vector<8x128xf32>
    %149 = arith.maximumf %147, %148 : vector<8x128xf32>
    %c0_56 = arith.constant 0 : index
    %c0_57 = arith.constant 0 : index
    %150 = vector.load %arg2[%c0_56, %c0_57] : memref<16x384xf32, #tpu.memory_space<vmem>>, vector<8x128xf32>
    tpu.vector_store %arg2[%c0_56, %c0_57], %149 {strides = array<i32>} : memref<16x384xf32, #tpu.memory_space<vmem>>, vector<8x128xf32>,
    %c0_58 = arith.constant 0 : index
    %c128_59 = arith.constant 128 : index
    %151 = vector.load %arg2[%c0_58, %c128_59] : memref<16x384xf32, #tpu.memory_space<vmem>>, vector<8x128xf32>
    tpu.vector_store %arg2[%c0_58, %c128_59], %68 {strides = array<i32>} : memref<16x384xf32, #tpu.memory_space<vmem>>, vector<8x128xf32>,
    %152 = arith.mulf %68, %68 : vector<8x128xf32>
    %cst_60 = arith.constant dense<0.000000e+00> : vector<8xf32>
    %153 = vector.multi_reduction <add>, %152, %cst_60 [1] : vector<8x128xf32> to vector<8xf32>
    %154 = vector.shape_cast %153 : vector<8xf32> to vector<8x1xf32>
    %cst_61 = arith.constant 1.000000e-24 : f32
    %155 = vector.broadcast %cst_61 : f32 to vector<8x1xf32>
    %156 = arith.maximumf %154, %155 : vector<8x1xf32>
    %157 = math.rsqrt %156 : vector<8x1xf32>
    %158 = vector.broadcast %157 : vector<8x1xf32> to vector<8x128xf32>
    %159 = arith.mulf %68, %158 : vector<8x128xf32>
    %c8 = arith.constant 8 : index
    %c0_62 = arith.constant 0 : index
    %160 = vector.load %arg0[%c8, %c0_62] : memref<16x128xf32, #tpu.memory_space<vmem>>, vector<8x128xf32>
    %c816 = arith.constant 816 : index
    %c0_63 = arith.constant 0 : index
    %161 = vector.load %arg1[%c816, %c0_63] : memref<1904x128xf32, #tpu.memory_space<vmem>>, vector<128x128xf32>
    %cst_64 = arith.constant dense<0.000000e+00> : vector<8x128xf32>
    %162 = tpu.matmul %160, %161, %cst_64 {dimension_numbers = #tpu.dot_dimension_numbers<[1], [0], [0], [1], [0, 0, 1, 1], [], []>} : vector<8x128xf32>, vector<128x128xf32>, vector<8x128xf32> -> vector<8x128xf32>
    %cst_65 = arith.constant dense<0.000000e+00> : vector<128xf32>
    %163 = vector.multi_reduction <add>, %162, %cst_65 [0] : vector<8x128xf32> to vector<128xf32>
    %164 = vector.shape_cast %163 : vector<128xf32> to vector<1x128xf32>
    %cst_66 = arith.constant 8.000000e+00 : f32
    %165 = vector.broadcast %cst_66 : f32 to vector<1x128xf32>
    %166 = arith.divf %164, %165 : vector<1x128xf32>
    %167 = vector.broadcast %166 : vector<1x128xf32> to vector<8x128xf32>
    %168 = arith.subf %162, %167 : vector<8x128xf32>
    %169 = arith.mulf %168, %168 : vector<8x128xf32>
    %cst_67 = arith.constant dense<0.000000e+00> : vector<128xf32>
    %170 = vector.multi_reduction <add>, %169, %cst_67 [0] : vector<8x128xf32> to vector<128xf32>
    %171 = vector.shape_cast %170 : vector<128xf32> to vector<1x128xf32>
    %cst_68 = arith.constant 8.000000e+00 : f32
    %172 = vector.broadcast %cst_68 : f32 to vector<1x128xf32>
    %173 = arith.divf %171, %172 : vector<1x128xf32>
    %c944 = arith.constant 944 : index
    %c0_69 = arith.constant 0 : index
    %174 = vector.load %arg1[%c944, %c0_69] : memref<1904x128xf32, #tpu.memory_space<vmem>>, vector<1x128xf32>
    %cst_70 = arith.constant 9.99999974E-6 : f32
    %175 = vector.broadcast %cst_70 : f32 to vector<1x128xf32>
    %176 = arith.addf %173, %175 : vector<1x128xf32>
    %177 = math.rsqrt %176 : vector<1x128xf32>
    %178 = arith.mulf %174, %177 : vector<1x128xf32>
    %c945 = arith.constant 945 : index
    %c0_71 = arith.constant 0 : index
    %179 = vector.load %arg1[%c945, %c0_71] : memref<1904x128xf32, #tpu.memory_space<vmem>>, vector<1x128xf32>
    %180 = arith.mulf %166, %178 : vector<1x128xf32>
    %181 = arith.subf %179, %180 : vector<1x128xf32>
    %182 = vector.broadcast %178 : vector<1x128xf32> to vector<8x128xf32>
    %183 = arith.mulf %162, %182 : vector<8x128xf32>
    %184 = vector.broadcast %181 : vector<1x128xf32> to vector<8x128xf32>
    %185 = arith.addf %183, %184 : vector<8x128xf32>
    %cst_72 = arith.constant 0.000000e+00 : f32
    %186 = vector.broadcast %cst_72 : f32 to vector<8x128xf32>
    %187 = arith.maximumf %185, %186 : vector<8x128xf32>
    %c952 = arith.constant 952 : index
    %c0_73 = arith.constant 0 : index
    %188 = vector.load %arg1[%c952, %c0_73] : memref<1904x128xf32, #tpu.memory_space<vmem>>, vector<128x128xf32>
    %cst_74 = arith.constant dense<0.000000e+00> : vector<8x128xf32>
    %189 = tpu.matmul %187, %188, %cst_74 {dimension_numbers = #tpu.dot_dimension_numbers<[1], [0], [0], [1], [0, 0, 1, 1], [], []>} : vector<8x128xf32>, vector<128x128xf32>, vector<8x128xf32> -> vector<8x128xf32>
    %cst_75 = arith.constant dense<0.000000e+00> : vector<128xf32>
    %190 = vector.multi_reduction <add>, %189, %cst_75 [0] : vector<8x128xf32> to vector<128xf32>
    %191 = vector.shape_cast %190 : vector<128xf32> to vector<1x128xf32>
    %cst_76 = arith.constant 8.000000e+00 : f32
    %192 = vector.broadcast %cst_76 : f32 to vector<1x128xf32>
    %193 = arith.divf %191, %192 : vector<1x128xf32>
    %194 = vector.broadcast %193 : vector<1x128xf32> to vector<8x128xf32>
    %195 = arith.subf %189, %194 : vector<8x128xf32>
    %196 = arith.mulf %195, %195 : vector<8x128xf32>
    %cst_77 = arith.constant dense<0.000000e+00> : vector<128xf32>
    %197 = vector.multi_reduction <add>, %196, %cst_77 [0] : vector<8x128xf32> to vector<128xf32>
    %198 = vector.shape_cast %197 : vector<128xf32> to vector<1x128xf32>
    %cst_78 = arith.constant 8.000000e+00 : f32
    %199 = vector.broadcast %cst_78 : f32 to vector<1x128xf32>
    %200 = arith.divf %198, %199 : vector<1x128xf32>
    %c1080 = arith.constant 1080 : index
    %c0_79 = arith.constant 0 : index
    %201 = vector.load %arg1[%c1080, %c0_79] : memref<1904x128xf32, #tpu.memory_space<vmem>>, vector<1x128xf32>
    %cst_80 = arith.constant 9.99999974E-6 : f32
    %202 = vector.broadcast %cst_80 : f32 to vector<1x128xf32>
    %203 = arith.addf %200, %202 : vector<1x128xf32>
    %204 = math.rsqrt %203 : vector<1x128xf32>
    %205 = arith.mulf %201, %204 : vector<1x128xf32>
    %c1081 = arith.constant 1081 : index
    %c0_81 = arith.constant 0 : index
    %206 = vector.load %arg1[%c1081, %c0_81] : memref<1904x128xf32, #tpu.memory_space<vmem>>, vector<1x128xf32>
    %207 = arith.mulf %193, %205 : vector<1x128xf32>
    %208 = arith.subf %206, %207 : vector<1x128xf32>
    %209 = vector.broadcast %205 : vector<1x128xf32> to vector<8x128xf32>
    %210 = arith.mulf %189, %209 : vector<8x128xf32>
    %211 = vector.broadcast %208 : vector<1x128xf32> to vector<8x128xf32>
    %212 = arith.addf %210, %211 : vector<8x128xf32>
    %cst_82 = arith.constant 0.000000e+00 : f32
    %213 = vector.broadcast %cst_82 : f32 to vector<8x128xf32>
    %214 = arith.maximumf %212, %213 : vector<8x128xf32>
    %c1088 = arith.constant 1088 : index
    %c0_83 = arith.constant 0 : index
    %215 = vector.load %arg1[%c1088, %c0_83] : memref<1904x128xf32, #tpu.memory_space<vmem>>, vector<128x128xf32>
    %cst_84 = arith.constant dense<0.000000e+00> : vector<8x128xf32>
    %216 = tpu.matmul %214, %215, %cst_84 {dimension_numbers = #tpu.dot_dimension_numbers<[1], [0], [0], [1], [0, 0, 1, 1], [], []>} : vector<8x128xf32>, vector<128x128xf32>, vector<8x128xf32> -> vector<8x128xf32>
    %c1216 = arith.constant 1216 : index
    %c0_85 = arith.constant 0 : index
    %217 = vector.load %arg1[%c1216, %c0_85] : memref<1904x128xf32, #tpu.memory_space<vmem>>, vector<1x128xf32>
    %218 = vector.broadcast %217 : vector<1x128xf32> to vector<8x128xf32>
    %219 = arith.addf %216, %218 : vector<8x128xf32>
    %cst_86 = arith.constant dense<0xFF800000> : vector<8xf32>
    %220 = vector.multi_reduction <maximumf>, %219, %cst_86 [1] : vector<8x128xf32> to vector<8xf32>
    %221 = vector.shape_cast %220 : vector<8xf32> to vector<8x1xf32>
    %222 = vector.broadcast %221 : vector<8x1xf32> to vector<8x128xf32>
    %223 = arith.subf %219, %222 : vector<8x128xf32>
    %224 = math.exp %223 : vector<8x128xf32>
    %cst_87 = arith.constant dense<0.000000e+00> : vector<8xf32>
    %225 = vector.multi_reduction <add>, %224, %cst_87 [1] : vector<8x128xf32> to vector<8xf32>
    %226 = vector.shape_cast %225 : vector<8xf32> to vector<8x1xf32>
    %227 = vector.broadcast %226 : vector<8x1xf32> to vector<8x128xf32>
    %228 = arith.divf %224, %227 : vector<8x128xf32>
    %c1224 = arith.constant 1224 : index
    %c0_88 = arith.constant 0 : index
    %229 = vector.load %arg1[%c1224, %c0_88] : memref<1904x128xf32, #tpu.memory_space<vmem>>, vector<128x128xf32>
    %cst_89 = arith.constant dense<0.000000e+00> : vector<8x128xf32>
    %230 = tpu.matmul %228, %229, %cst_89 {dimension_numbers = #tpu.dot_dimension_numbers<[1], [0], [0], [1], [0, 0, 1, 1], [], []>} : vector<8x128xf32>, vector<128x128xf32>, vector<8x128xf32> -> vector<8x128xf32>
    %cst_90 = arith.constant dense<0.000000e+00> : vector<128xf32>
    %231 = vector.multi_reduction <add>, %230, %cst_90 [0] : vector<8x128xf32> to vector<128xf32>
    %232 = vector.shape_cast %231 : vector<128xf32> to vector<1x128xf32>
    %cst_91 = arith.constant 8.000000e+00 : f32
    %233 = vector.broadcast %cst_91 : f32 to vector<1x128xf32>
    %234 = arith.divf %232, %233 : vector<1x128xf32>
    %235 = vector.broadcast %234 : vector<1x128xf32> to vector<8x128xf32>
    %236 = arith.subf %230, %235 : vector<8x128xf32>
    %237 = arith.mulf %236, %236 : vector<8x128xf32>
    %cst_92 = arith.constant dense<0.000000e+00> : vector<128xf32>
    %238 = vector.multi_reduction <add>, %237, %cst_92 [0] : vector<8x128xf32> to vector<128xf32>
    %239 = vector.shape_cast %238 : vector<128xf32> to vector<1x128xf32>
    %cst_93 = arith.constant 8.000000e+00 : f32
    %240 = vector.broadcast %cst_93 : f32 to vector<1x128xf32>
    %241 = arith.divf %239, %240 : vector<1x128xf32>
    %c1352 = arith.constant 1352 : index
    %c0_94 = arith.constant 0 : index
    %242 = vector.load %arg1[%c1352, %c0_94] : memref<1904x128xf32, #tpu.memory_space<vmem>>, vector<1x128xf32>
    %cst_95 = arith.constant 9.99999974E-6 : f32
    %243 = vector.broadcast %cst_95 : f32 to vector<1x128xf32>
    %244 = arith.addf %241, %243 : vector<1x128xf32>
    %245 = math.rsqrt %244 : vector<1x128xf32>
    %246 = arith.mulf %242, %245 : vector<1x128xf32>
    %c1353 = arith.constant 1353 : index
    %c0_96 = arith.constant 0 : index
    %247 = vector.load %arg1[%c1353, %c0_96] : memref<1904x128xf32, #tpu.memory_space<vmem>>, vector<1x128xf32>
    %248 = arith.mulf %234, %246 : vector<1x128xf32>
    %249 = arith.subf %247, %248 : vector<1x128xf32>
    %250 = vector.broadcast %246 : vector<1x128xf32> to vector<8x128xf32>
    %251 = arith.mulf %230, %250 : vector<8x128xf32>
    %252 = vector.broadcast %249 : vector<1x128xf32> to vector<8x128xf32>
    %253 = arith.addf %251, %252 : vector<8x128xf32>
    %cst_97 = arith.constant 0.000000e+00 : f32
    %254 = vector.broadcast %cst_97 : f32 to vector<8x128xf32>
    %255 = arith.maximumf %253, %254 : vector<8x128xf32>
    %c1360 = arith.constant 1360 : index
    %c0_98 = arith.constant 0 : index
    %256 = vector.load %arg1[%c1360, %c0_98] : memref<1904x128xf32, #tpu.memory_space<vmem>>, vector<128x128xf32>
    %cst_99 = arith.constant dense<0.000000e+00> : vector<8x128xf32>
    %257 = tpu.matmul %255, %256, %cst_99 {dimension_numbers = #tpu.dot_dimension_numbers<[1], [0], [0], [1], [0, 0, 1, 1], [], []>} : vector<8x128xf32>, vector<128x128xf32>, vector<8x128xf32> -> vector<8x128xf32>
    %cst_100 = arith.constant dense<0.000000e+00> : vector<128xf32>
    %258 = vector.multi_reduction <add>, %257, %cst_100 [0] : vector<8x128xf32> to vector<128xf32>
    %259 = vector.shape_cast %258 : vector<128xf32> to vector<1x128xf32>
    %cst_101 = arith.constant 8.000000e+00 : f32
    %260 = vector.broadcast %cst_101 : f32 to vector<1x128xf32>
    %261 = arith.divf %259, %260 : vector<1x128xf32>
    %262 = vector.broadcast %261 : vector<1x128xf32> to vector<8x128xf32>
    %263 = arith.subf %257, %262 : vector<8x128xf32>
    %264 = arith.mulf %263, %263 : vector<8x128xf32>
    %cst_102 = arith.constant dense<0.000000e+00> : vector<128xf32>
    %265 = vector.multi_reduction <add>, %264, %cst_102 [0] : vector<8x128xf32> to vector<128xf32>
    %266 = vector.shape_cast %265 : vector<128xf32> to vector<1x128xf32>
    %cst_103 = arith.constant 8.000000e+00 : f32
    %267 = vector.broadcast %cst_103 : f32 to vector<1x128xf32>
    %268 = arith.divf %266, %267 : vector<1x128xf32>
    %c1488 = arith.constant 1488 : index
    %c0_104 = arith.constant 0 : index
    %269 = vector.load %arg1[%c1488, %c0_104] : memref<1904x128xf32, #tpu.memory_space<vmem>>, vector<1x128xf32>
    %cst_105 = arith.constant 9.99999974E-6 : f32
    %270 = vector.broadcast %cst_105 : f32 to vector<1x128xf32>
    %271 = arith.addf %268, %270 : vector<1x128xf32>
    %272 = math.rsqrt %271 : vector<1x128xf32>
    %273 = arith.mulf %269, %272 : vector<1x128xf32>
    %c1489 = arith.constant 1489 : index
    %c0_106 = arith.constant 0 : index
    %274 = vector.load %arg1[%c1489, %c0_106] : memref<1904x128xf32, #tpu.memory_space<vmem>>, vector<1x128xf32>
    %275 = arith.mulf %261, %273 : vector<1x128xf32>
    %276 = arith.subf %274, %275 : vector<1x128xf32>
    %277 = vector.broadcast %273 : vector<1x128xf32> to vector<8x128xf32>
    %278 = arith.mulf %257, %277 : vector<8x128xf32>
    %279 = vector.broadcast %276 : vector<1x128xf32> to vector<8x128xf32>
    %280 = arith.addf %278, %279 : vector<8x128xf32>
    %cst_107 = arith.constant 0.000000e+00 : f32
    %281 = vector.broadcast %cst_107 : f32 to vector<8x128xf32>
    %282 = arith.maximumf %280, %281 : vector<8x128xf32>
    %c1496 = arith.constant 1496 : index
    %c0_108 = arith.constant 0 : index
    %283 = vector.load %arg1[%c1496, %c0_108] : memref<1904x128xf32, #tpu.memory_space<vmem>>, vector<128x128xf32>
    %cst_109 = arith.constant dense<0.000000e+00> : vector<8x128xf32>
    %284 = tpu.matmul %282, %283, %cst_109 {dimension_numbers = #tpu.dot_dimension_numbers<[1], [0], [0], [1], [0, 0, 1, 1], [], []>} : vector<8x128xf32>, vector<128x128xf32>, vector<8x128xf32> -> vector<8x128xf32>
    %cst_110 = arith.constant dense<0.000000e+00> : vector<128xf32>
    %285 = vector.multi_reduction <add>, %284, %cst_110 [0] : vector<8x128xf32> to vector<128xf32>
    %286 = vector.shape_cast %285 : vector<128xf32> to vector<1x128xf32>
    %cst_111 = arith.constant 8.000000e+00 : f32
    %287 = vector.broadcast %cst_111 : f32 to vector<1x128xf32>
    %288 = arith.divf %286, %287 : vector<1x128xf32>
    %289 = vector.broadcast %288 : vector<1x128xf32> to vector<8x128xf32>
    %290 = arith.subf %284, %289 : vector<8x128xf32>
    %291 = arith.mulf %290, %290 : vector<8x128xf32>
    %cst_112 = arith.constant dense<0.000000e+00> : vector<128xf32>
    %292 = vector.multi_reduction <add>, %291, %cst_112 [0] : vector<8x128xf32> to vector<128xf32>
    %293 = vector.shape_cast %292 : vector<128xf32> to vector<1x128xf32>
    %cst_113 = arith.constant 8.000000e+00 : f32
    %294 = vector.broadcast %cst_113 : f32 to vector<1x128xf32>
    %295 = arith.divf %293, %294 : vector<1x128xf32>
    %c1624 = arith.constant 1624 : index
    %c0_114 = arith.constant 0 : index
    %296 = vector.load %arg1[%c1624, %c0_114] : memref<1904x128xf32, #tpu.memory_space<vmem>>, vector<1x128xf32>
    %cst_115 = arith.constant 9.99999974E-6 : f32
    %297 = vector.broadcast %cst_115 : f32 to vector<1x128xf32>
    %298 = arith.addf %295, %297 : vector<1x128xf32>
    %299 = math.rsqrt %298 : vector<1x128xf32>
    %300 = arith.mulf %296, %299 : vector<1x128xf32>
    %c1625 = arith.constant 1625 : index
    %c0_116 = arith.constant 0 : index
    %301 = vector.load %arg1[%c1625, %c0_116] : memref<1904x128xf32, #tpu.memory_space<vmem>>, vector<1x128xf32>
    %302 = arith.mulf %288, %300 : vector<1x128xf32>
    %303 = arith.subf %301, %302 : vector<1x128xf32>
    %304 = vector.broadcast %300 : vector<1x128xf32> to vector<8x128xf32>
    %305 = arith.mulf %284, %304 : vector<8x128xf32>
    %306 = vector.broadcast %303 : vector<1x128xf32> to vector<8x128xf32>
    %307 = arith.addf %305, %306 : vector<8x128xf32>
    %cst_117 = arith.constant 0.000000e+00 : f32
    %308 = vector.broadcast %cst_117 : f32 to vector<8x128xf32>
    %309 = arith.maximumf %307, %308 : vector<8x128xf32>
    %c8_118 = arith.constant 8 : index
    %c0_119 = arith.constant 0 : index
    %310 = vector.load %arg2[%c8_118, %c0_119] : memref<16x384xf32, #tpu.memory_space<vmem>>, vector<8x128xf32>
    tpu.vector_store %arg2[%c8_118, %c0_119], %309 {strides = array<i32>} : memref<16x384xf32, #tpu.memory_space<vmem>>, vector<8x128xf32>,
    %c8_120 = arith.constant 8 : index
    %c128_121 = arith.constant 128 : index
    %311 = vector.load %arg2[%c8_120, %c128_121] : memref<16x384xf32, #tpu.memory_space<vmem>>, vector<8x128xf32>
    tpu.vector_store %arg2[%c8_120, %c128_121], %228 {strides = array<i32>} : memref<16x384xf32, #tpu.memory_space<vmem>>, vector<8x128xf32>,
    %312 = arith.mulf %228, %228 : vector<8x128xf32>
    %cst_122 = arith.constant dense<0.000000e+00> : vector<8xf32>
    %313 = vector.multi_reduction <add>, %312, %cst_122 [1] : vector<8x128xf32> to vector<8xf32>
    %314 = vector.shape_cast %313 : vector<8xf32> to vector<8x1xf32>
    %cst_123 = arith.constant 1.000000e-24 : f32
    %315 = vector.broadcast %cst_123 : f32 to vector<8x1xf32>
    %316 = arith.maximumf %314, %315 : vector<8x1xf32>
    %317 = math.rsqrt %316 : vector<8x1xf32>
    %318 = vector.broadcast %317 : vector<8x1xf32> to vector<8x128xf32>
    %319 = arith.mulf %228, %318 : vector<8x128xf32>
    %320 = tpu.concatenate %159, %319 in 0 : vector<8x128xf32>, vector<8x128xf32> -> vector<16x128xf32>
    %c1632 = arith.constant 1632 : index
    %c0_124 = arith.constant 0 : index
    %321 = vector.load %arg1[%c1632, %c0_124] : memref<1904x128xf32, #tpu.memory_space<vmem>>, vector<128x128xf32>
    %cst_125 = arith.constant dense<0.000000e+00> : vector<16x128xf32>
    %322 = tpu.matmul %320, %321, %cst_125 {dimension_numbers = #tpu.dot_dimension_numbers<[1], [0], [0], [1], [0, 0, 1, 1], [], []>} : vector<16x128xf32>, vector<128x128xf32>, vector<16x128xf32> -> vector<16x128xf32>
    %c1760 = arith.constant 1760 : index
    %c0_126 = arith.constant 0 : index
    %323 = vector.load %arg1[%c1760, %c0_126] : memref<1904x128xf32, #tpu.memory_space<vmem>>, vector<1x128xf32>
    %c1761 = arith.constant 1761 : index
    %c0_127 = arith.constant 0 : index
    %324 = vector.load %arg1[%c1761, %c0_127] : memref<1904x128xf32, #tpu.memory_space<vmem>>, vector<1x128xf32>
    %325 = vector.extract_strided_slice %322 {offsets = [0, 0], sizes = [8, 128], strides = [1, 1]} : vector<16x128xf32> to vector<8x128xf32>
    %cst_128 = arith.constant dense<0.000000e+00> : vector<128xf32>
    %326 = vector.multi_reduction <add>, %325, %cst_128 [0] : vector<8x128xf32> to vector<128xf32>
    %327 = vector.shape_cast %326 : vector<128xf32> to vector<1x128xf32>
    %cst_129 = arith.constant 8.000000e+00 : f32
    %328 = vector.broadcast %cst_129 : f32 to vector<1x128xf32>
    %329 = arith.divf %327, %328 : vector<1x128xf32>
    %330 = vector.broadcast %329 : vector<1x128xf32> to vector<8x128xf32>
    %331 = arith.subf %325, %330 : vector<8x128xf32>
    %332 = arith.mulf %331, %331 : vector<8x128xf32>
    %cst_130 = arith.constant dense<0.000000e+00> : vector<128xf32>
    %333 = vector.multi_reduction <add>, %332, %cst_130 [0] : vector<8x128xf32> to vector<128xf32>
    %334 = vector.shape_cast %333 : vector<128xf32> to vector<1x128xf32>
    %cst_131 = arith.constant 8.000000e+00 : f32
    %335 = vector.broadcast %cst_131 : f32 to vector<1x128xf32>
    %336 = arith.divf %334, %335 : vector<1x128xf32>
    %cst_132 = arith.constant 9.99999974E-6 : f32
    %337 = vector.broadcast %cst_132 : f32 to vector<1x128xf32>
    %338 = arith.addf %336, %337 : vector<1x128xf32>
    %339 = math.rsqrt %338 : vector<1x128xf32>
    %340 = arith.mulf %323, %339 : vector<1x128xf32>
    %341 = arith.mulf %329, %340 : vector<1x128xf32>
    %342 = arith.subf %324, %341 : vector<1x128xf32>
    %343 = vector.broadcast %340 : vector<1x128xf32> to vector<8x128xf32>
    %344 = arith.mulf %325, %343 : vector<8x128xf32>
    %345 = vector.broadcast %342 : vector<1x128xf32> to vector<8x128xf32>
    %346 = arith.addf %344, %345 : vector<8x128xf32>
    %cst_133 = arith.constant 0.000000e+00 : f32
    %347 = vector.broadcast %cst_133 : f32 to vector<8x128xf32>
    %348 = arith.maximumf %346, %347 : vector<8x128xf32>
    %349 = vector.extract_strided_slice %322 {offsets = [8, 0], sizes = [8, 128], strides = [1, 1]} : vector<16x128xf32> to vector<8x128xf32>
    %cst_134 = arith.constant dense<0.000000e+00> : vector<128xf32>
    %350 = vector.multi_reduction <add>, %349, %cst_134 [0] : vector<8x128xf32> to vector<128xf32>
    %351 = vector.shape_cast %350 : vector<128xf32> to vector<1x128xf32>
    %cst_135 = arith.constant 8.000000e+00 : f32
    %352 = vector.broadcast %cst_135 : f32 to vector<1x128xf32>
    %353 = arith.divf %351, %352 : vector<1x128xf32>
    %354 = vector.broadcast %353 : vector<1x128xf32> to vector<8x128xf32>
    %355 = arith.subf %349, %354 : vector<8x128xf32>
    %356 = arith.mulf %355, %355 : vector<8x128xf32>
    %cst_136 = arith.constant dense<0.000000e+00> : vector<128xf32>
    %357 = vector.multi_reduction <add>, %356, %cst_136 [0] : vector<8x128xf32> to vector<128xf32>
    %358 = vector.shape_cast %357 : vector<128xf32> to vector<1x128xf32>
    %cst_137 = arith.constant 8.000000e+00 : f32
    %359 = vector.broadcast %cst_137 : f32 to vector<1x128xf32>
    %360 = arith.divf %358, %359 : vector<1x128xf32>
    %cst_138 = arith.constant 9.99999974E-6 : f32
    %361 = vector.broadcast %cst_138 : f32 to vector<1x128xf32>
    %362 = arith.addf %360, %361 : vector<1x128xf32>
    %363 = math.rsqrt %362 : vector<1x128xf32>
    %364 = arith.mulf %323, %363 : vector<1x128xf32>
    %365 = arith.mulf %353, %364 : vector<1x128xf32>
    %366 = arith.subf %324, %365 : vector<1x128xf32>
    %367 = vector.broadcast %364 : vector<1x128xf32> to vector<8x128xf32>
    %368 = arith.mulf %349, %367 : vector<8x128xf32>
    %369 = vector.broadcast %366 : vector<1x128xf32> to vector<8x128xf32>
    %370 = arith.addf %368, %369 : vector<8x128xf32>
    %cst_139 = arith.constant 0.000000e+00 : f32
    %371 = vector.broadcast %cst_139 : f32 to vector<8x128xf32>
    %372 = arith.maximumf %370, %371 : vector<8x128xf32>
    %373 = tpu.concatenate %348, %372 in 0 : vector<8x128xf32>, vector<8x128xf32> -> vector<16x128xf32>
    %c1768 = arith.constant 1768 : index
    %c0_140 = arith.constant 0 : index
    %374 = vector.load %arg1[%c1768, %c0_140] : memref<1904x128xf32, #tpu.memory_space<vmem>>, vector<128x128xf32>
    %cst_141 = arith.constant dense<0.000000e+00> : vector<16x128xf32>
    %375 = tpu.matmul %373, %374, %cst_141 {dimension_numbers = #tpu.dot_dimension_numbers<[1], [0], [0], [1], [0, 0, 1, 1], [], []>} : vector<16x128xf32>, vector<128x128xf32>, vector<16x128xf32> -> vector<16x128xf32>
    %c1896 = arith.constant 1896 : index
    %c0_142 = arith.constant 0 : index
    %376 = vector.load %arg1[%c1896, %c0_142] : memref<1904x128xf32, #tpu.memory_space<vmem>>, vector<1x128xf32>
    %377 = vector.broadcast %376 : vector<1x128xf32> to vector<16x128xf32>
    %378 = arith.addf %375, %377 : vector<16x128xf32>
    %cst_143 = arith.constant dense<0xFF800000> : vector<16xf32>
    %379 = vector.multi_reduction <maximumf>, %378, %cst_143 [1] : vector<16x128xf32> to vector<16xf32>
    %380 = vector.shape_cast %379 : vector<16xf32> to vector<16x1xf32>
    %381 = vector.broadcast %380 : vector<16x1xf32> to vector<16x128xf32>
    %382 = arith.subf %378, %381 : vector<16x128xf32>
    %383 = math.exp %382 : vector<16x128xf32>
    %cst_144 = arith.constant dense<0.000000e+00> : vector<16xf32>
    %384 = vector.multi_reduction <add>, %383, %cst_144 [1] : vector<16x128xf32> to vector<16xf32>
    %385 = vector.shape_cast %384 : vector<16xf32> to vector<16x1xf32>
    %386 = vector.broadcast %385 : vector<16x1xf32> to vector<16x128xf32>
    %387 = arith.divf %383, %386 : vector<16x128xf32>
    %c0_145 = arith.constant 0 : index
    %c256 = arith.constant 256 : index
    %388 = vector.load %arg2[%c0_145, %c256] : memref<16x384xf32, #tpu.memory_space<vmem>>, vector<16x128xf32>
    tpu.vector_store %arg2[%c0_145, %c256], %387 {strides = array<i32>} : memref<16x384xf32, #tpu.memory_space<vmem>>, vector<16x128xf32>,
    return
  }
}

</mosaic_0001>

<bundles_post_ra>
// kernel: apply.1
= control target key start
LH: loop header
LB: loop body
LE: loop exit
PB: predicated region body
PF: predicated region fallthrough
CT: control target
= control target key end

     0   :  { %7 = vsyncpa [#allocation3], 0  ;;  %s2527_s9 = smov [#allocation2]   ;;  %s2856_s0 = inlined_call_operand.vmem [shape: f32[16,128], index: 0, kind: input, shape index: {}]   ;;  %s2857_s1 = inlined_call_operand.hbm [shape: f32[1904,128], index: 1, kind: input, shape index: {}]   ;;  %s2858_s2 = inlined_call_operand.vmem [shape: f32[16,384], index: 2, kind: output, shape index: {}]  }
   0x1   :  { %s15_s10 = sshll.u32 %s2527_s9, 4  ;;  %s16_s10 = int_to_ptr.vmem [resolvable:$true] %s15_s10 }
   0x2   :  { %s2513_s11 = scalar_lea.vmem %s16_s10, 30464  ;;  %p2518_p1 = scmp.lt.s32.totalorder %s16_s10, %s16_s10 }
   0x3   :  { %p2514_p0 = scmp.ne.s32.totalorder %s16_s10, %s2513_s11  ;;  %p2519_p2 = scmp.lt.s32.totalorder %s2513_s11, %s2513_s11 }
   0x5   :  { %p2520_p3 = por %p2519_p2, %p2518_p1 }
   0x7   :  { %p2521_p4 = pnand %p2520_p3, %p2514_p0 }
   0x9   :  { %2524 = shalt.err (!%p2521_p4)
}
   0xa   :  { %s2528_s12 = smov 128   ;;  %s2529_s13 = smov 8  }
   0xb   :  { %21 = dma.hbm_to_vmem [thread:$0]  %s2857_s1, 30464, %s16_s10, [#allocation3], %s2528_s12, %s2528_s12, %s2529_s13  }
   0xc   :  { %2525 = dma.done.wait [#allocation3], 30464  }
   0xd   :  { %2526 = vsyncadd [#allocation3], 4294936832  ;;  %v2530_v0 = vmov 0.0   ;;  %vm2531_vm0 = vmmov 0   ;;  %v41_v1 = vld [vmem:[#allocation2 + $0x78] sm:$0xff]  ;;  %v40_v2 = vld [vmem:[#allocation2 + $0x70] sm:$0xff]  ;;  %v136_v53 = vlaneseq }
   0xe   :  { %1965 = vmatprep.subr.mxu0 %v2530_v0  ;;  %1997 = vmatprep.mubr.msk.f32.mxu0 %vm2531_vm0, %v2530_v0  ;;  %v39_v3 = vld [vmem:[#allocation2 + $0x68] sm:$0xff]  ;;  %v38_v4 = vld [vmem:[#allocation2 + $0x60] sm:$0xff]  ;;  %v37_v5 = vld [vmem:[#allocation2 + $0x58] sm:$0xff] }
   0xf   :  { %2000 = vmatprep.subr.mxu1 %v2530_v0  ;;  %2032 = vmatprep.mubr.msk.f32.mxu1 %vm2531_vm0, %v2530_v0  ;;  %v36_v6 = vld [vmem:[#allocation2 + $0x50] sm:$0xff]  ;;  %v35_v7 = vld [vmem:[#allocation2 + $0x48] sm:$0xff]  ;;  %v34_v8 = vld [vmem:[#allocation2 + $0x40] sm:$0xff]  ;;  %v137_v54 = vshrl.u32 %v136_v53, 7 }
  0x10   :  { %1966 = vmatpush3.msra.mxu0 %v41_v1  ;;  %v33_v9 = vld [vmem:[#allocation2 + $0x38] sm:$0xff]  ;;  %v32_v10 = vld [vmem:[#allocation2 + $0x30] sm:$0xff]  ;;  %v31_v11 = vld [vmem:[#allocation2 + $0x28] sm:$0xff] }
  0x11   :  { %1967 = vmatprep.subr.mxu0 %v2530_v0  ;;  %v30_v12 = vld [vmem:[#allocation2 + $0x20] sm:$0xff]  ;;  %v29_v13 = vld [vmem:[#allocation2 + $0x18] sm:$0xff]  ;;  %v28_v14 = vld [vmem:[#allocation2 + $0x10] sm:$0xff]  ;;  %v2593_v56 = vsub.s32 0, %v137_v54 }
  0x12   :  { %1968 = vmatpush3.msra.mxu0 %v40_v2  ;;  %v27_v15 = vld [vmem:[#allocation2 + $0x8] sm:$0xff]  ;;  %v26_v16 = vld [vmem:[#allocation2] sm:$0xff]  ;;  %v161_v19 = vld [vmem:[#allocation2 + $0xf8] sm:$0xff] }
  0x13   :  { %1969 = vmatprep.subr.mxu0 %v2530_v0  ;;  %v25_v17 = vld [vmem:[%s2856_s0] sm:$0xff]  ;;  %v160_v20 = vld [vmem:[#allocation2 + $0xf0] sm:$0xff]  ;;  %v159_v21 = vld [vmem:[#allocation2 + $0xe8] sm:$0xff] }
  0x14   :  { %1970 = vmatpush3.msra.mxu0 %v39_v3  ;;  %v162_v18 = vld [vmem:[#allocation2 + $0x100] sm:$0xff]  ;;  %v157_v23 = vld [vmem:[#allocation2 + $0xd8] sm:$0xff]  ;;  %v156_v24 = vld [vmem:[#allocation2 + $0xd0] sm:$0xff] }
  0x15   :  { %1971 = vmatprep.subr.mxu0 %v2530_v0  ;;  %2001 = vmatpush3.msra.mxu1 %v162_v18  ;;  %v158_v22 = vld [vmem:[#allocation2 + $0xe0] sm:$0xff]  ;;  %v155_v25 = vld [vmem:[#allocation2 + $0xc8] sm:$0xff]  ;;  %v153_v27 = vld [vmem:[#allocation2 + $0xb8] sm:$0xff] }
  0x16   :  { %1972 = vmatpush3.msra.mxu0 %v38_v4  ;;  %2002 = vmatprep.subr.mxu1 %v2530_v0  ;;  %v154_v26 = vld [vmem:[#allocation2 + $0xc0] sm:$0xff]  ;;  %v152_v28 = vld [vmem:[#allocation2 + $0xb0] sm:$0xff]  ;;  %v151_v29 = vld [vmem:[#allocation2 + $0xa8] sm:$0xff] }
  0x17   :  { %1973 = vmatprep.subr.mxu0 %v2530_v0  ;;  %2003 = vmatpush3.msra.mxu1 %v161_v19  ;;  %v150_v30 = vld [vmem:[#allocation2 + $0xa0] sm:$0xff]  ;;  %v149_v31 = vld [vmem:[#allocation2 + $0x98] sm:$0xff]  ;;  %v148_v32 = vld [vmem:[#allocation2 + $0x90] sm:$0xff] }
  0x18   :  { %1974 = vmatpush3.msra.mxu0 %v37_v5  ;;  %2004 = vmatprep.subr.mxu1 %v2530_v0  ;;  %v147_v33 = vld [vmem:[#allocation2 + $0x88] sm:$0xff]  ;;  %v129_v55 = vld [vmem:[#allocation2 + $0x80] sm:$0x1]  ;;  %v133_v59 = vld [vmem:[#allocation2 + $0x81] sm:$0x1] }
  0x19   :  { %1975 = vmatprep.subr.mxu0 %v2530_v0  ;;  %2005 = vmatpush3.msra.mxu1 %v160_v20  ;;  %v282_v4 = vld [vmem:[#allocation2 + $0x188] sm:$0xff]  ;;  %v281_v5 = vld [vmem:[#allocation2 + $0x180] sm:$0xff]  ;;  %v268_v18 = vld [vmem:[#allocation2 + $0x118] sm:$0xff] }
  0x1a   :  { %1976 = vmatpush3.msra.mxu0 %v36_v6  ;;  %2006 = vmatprep.subr.mxu1 %v2530_v0  ;;  %v280_v6 = vld [vmem:[#allocation2 + $0x178] sm:$0xff]  ;;  %v267_v19 = vld [vmem:[#allocation2 + $0x110] sm:$0xff] }
  0x1b   :  { %1977 = vmatprep.subr.mxu0 %v2530_v0  ;;  %2007 = vmatpush3.msra.mxu1 %v159_v21  ;;  %v382_v54 = vld [vmem:[#allocation2 + $0x210] sm:$0xff] }
  0x1c   :  { %1978 = vmatpush3.msra.mxu0 %v35_v7  ;;  %2008 = vmatprep.subr.mxu1 %v2530_v0  ;;  %v279_v7 = vld [vmem:[#allocation2 + $0x170] sm:$0xff] }
  0x1d   :  { %1979 = vmatprep.subr.mxu0 %v2530_v0  ;;  %2009 = vmatpush3.msra.mxu1 %v158_v22 }
  0x1e   :  { %1980 = vmatpush3.msra.mxu0 %v34_v8  ;;  %2010 = vmatprep.subr.mxu1 %v2530_v0  ;;  %v278_v8 = vld [vmem:[#allocation2 + $0x168] sm:$0xff] }
  0x1f   :  { %1981 = vmatprep.subr.mxu0 %v2530_v0  ;;  %2011 = vmatpush3.msra.mxu1 %v157_v23 }
  0x20   :  { %1982 = vmatpush3.msra.mxu0 %v33_v9  ;;  %2012 = vmatprep.subr.mxu1 %v2530_v0  ;;  %v277_v9 = vld [vmem:[#allocation2 + $0x160] sm:$0xff] }
  0x21   :  { %1983 = vmatprep.subr.mxu0 %v2530_v0  ;;  %2013 = vmatpush3.msra.mxu1 %v156_v24 }
  0x22   :  { %1984 = vmatpush3.msra.mxu0 %v32_v10  ;;  %2014 = vmatprep.subr.mxu1 %v2530_v0  ;;  %v276_v10 = vld [vmem:[#allocation2 + $0x158] sm:$0xff] }
  0x23   :  { %1985 = vmatprep.subr.mxu0 %v2530_v0  ;;  %2015 = vmatpush3.msra.mxu1 %v155_v25 }
  0x24   :  { %1986 = vmatpush3.msra.mxu0 %v31_v11  ;;  %2016 = vmatprep.subr.mxu1 %v2530_v0  ;;  %v275_v11 = vld [vmem:[#allocation2 + $0x150] sm:$0xff] }
  0x25   :  { %1987 = vmatprep.subr.mxu0 %v2530_v0  ;;  %2017 = vmatpush3.msra.mxu1 %v154_v26 }
  0x26   :  { %1988 = vmatpush3.msra.mxu0 %v30_v12  ;;  %2018 = vmatprep.subr.mxu1 %v2530_v0  ;;  %v274_v12 = vld [vmem:[#allocation2 + $0x148] sm:$0xff] }
  0x27   :  { %1989 = vmatprep.subr.mxu0 %v2530_v0  ;;  %2019 = vmatpush3.msra.mxu1 %v153_v27 }
  0x28   :  { %1990 = vmatpush3.msra.mxu0 %v29_v13  ;;  %2020 = vmatprep.subr.mxu1 %v2530_v0  ;;  %v273_v13 = vld [vmem:[#allocation2 + $0x140] sm:$0xff] }
  0x29   :  { %1991 = vmatprep.subr.mxu0 %v2530_v0  ;;  %2021 = vmatpush3.msra.mxu1 %v152_v28 }
  0x2a   :  { %1992 = vmatpush3.msra.mxu0 %v28_v14  ;;  %2022 = vmatprep.subr.mxu1 %v2530_v0  ;;  %v272_v14 = vld [vmem:[#allocation2 + $0x138] sm:$0xff] }
  0x2b   :  { %1993 = vmatprep.subr.mxu0 %v2530_v0  ;;  %2023 = vmatpush3.msra.mxu1 %v151_v29 }
  0x2c   :  { %1994 = vmatpush3.msra.mxu0 %v27_v15  ;;  %2024 = vmatprep.subr.mxu1 %v2530_v0  ;;  %v271_v15 = vld [vmem:[#allocation2 + $0x130] sm:$0xff] }
  0x2d   :  { %1995 = vmatprep.subr.mxu0 %v2530_v0  ;;  %2025 = vmatpush3.msra.mxu1 %v150_v30 }
  0x2e   :  { %1996 = vmatpush3.msra.mxu0 %v26_v16  ;;  %2026 = vmatprep.subr.mxu1 %v2530_v0  ;;  %v270_v16 = vld [vmem:[#allocation2 + $0x128] sm:$0xff] }
  0x2f   :  { %1998 = vmatmul.mubr.f32.vlgmr.msra.gmra.mxu0 %v25_v17  ;;  %2035 = vmatprep.subr.mxu0 %v2530_v0  ;;  %v269_v17 = vld [vmem:[#allocation2 + $0x120] sm:$0xff] }
  0x30   :  { %2067 = vmatprep.mubr.msk.f32.mxu0 %vm2531_vm0, %v2530_v0  ;;  %2027 = vmatpush3.msra.mxu1 %v149_v31 }
  0x31   :  { %2028 = vmatprep.subr.mxu1 %v2530_v0  ;;  %2036 = vmatpush3.msra.mxu0 %v282_v4  ;;  %v374_v4 = vld [vmem:[#allocation2 + $0x1d0] sm:$0xff] }
  0x32   :  { %2029 = vmatpush3.msra.mxu1 %v148_v32  ;;  %2037 = vmatprep.subr.mxu0 %v2530_v0 }
  0x33   :  { %2030 = vmatprep.subr.mxu1 %v2530_v0  ;;  %2038 = vmatpush3.msra.mxu0 %v281_v5  ;;  %v373_v5 = vld [vmem:[#allocation2 + $0x1c8] sm:$0xff] }
  0x34   :  { %2031 = vmatpush3.msra.mxu1 %v147_v33  ;;  %2039 = vmatprep.subr.mxu0 %v2530_v0 }
  0x35   :  { %2070 = vmatprep.subr.mxu1 %v2530_v0  ;;  %2040 = vmatpush3.msra.mxu0 %v280_v6  ;;  %v372_v6 = vld [vmem:[#allocation2 + $0x1c0] sm:$0xff] }
  0x36   :  { %2041 = vmatprep.subr.mxu0 %v2530_v0 }
  0x37   :  { %2042 = vmatpush3.msra.mxu0 %v279_v7  ;;  %v371_v7 = vld [vmem:[#allocation2 + $0x1b8] sm:$0xff] }
  0x38   :  { %2043 = vmatprep.subr.mxu0 %v2530_v0 }
  0x39   :  { %2044 = vmatpush3.msra.mxu0 %v278_v8  ;;  %v370_v8 = vld [vmem:[#allocation2 + $0x1b0] sm:$0xff] }
  0x3a   :  { %2045 = vmatprep.subr.mxu0 %v2530_v0 }
  0x3b   :  { %2046 = vmatpush3.msra.mxu0 %v277_v9  ;;  %v369_v9 = vld [vmem:[#allocation2 + $0x1a8] sm:$0xff] }
  0x3c   :  { %2047 = vmatprep.subr.mxu0 %v2530_v0 }
  0x3d   :  { %2048 = vmatpush3.msra.mxu0 %v276_v10  ;;  %v368_v10 = vld [vmem:[#allocation2 + $0x1a0] sm:$0xff] }
  0x3e   :  { %2049 = vmatprep.subr.mxu0 %v2530_v0 }
  0x3f   :  { %2050 = vmatpush3.msra.mxu0 %v275_v11  ;;  %v367_v11 = vld [vmem:[#allocation2 + $0x198] sm:$0xff] }
  0x40   :  { %2051 = vmatprep.subr.mxu0 %v2530_v0 }
  0x41   :  { %2052 = vmatpush3.msra.mxu0 %v274_v12 }
  0x42   :  { %2053 = vmatprep.subr.mxu0 %v2530_v0 }
  0x43   :  { %2054 = vmatpush3.msra.mxu0 %v273_v13 }
  0x44   :  { %2055 = vmatprep.subr.mxu0 %v2530_v0 }
  0x45   :  { %2056 = vmatpush3.msra.mxu0 %v272_v14 }
  0x46   :  { %2057 = vmatprep.subr.mxu0 %v2530_v0 }
  0x47   :  { %2058 = vmatpush3.msra.mxu0 %v271_v15 }
  0x48   :  { %2059 = vmatprep.subr.mxu0 %v2530_v0 }
  0x49   :  { %2060 = vmatpush3.msra.mxu0 %v270_v16  ;;  %v502_v16 = vld [vmem:[#allocation2 + $0x298] sm:$0xff] }
  0x4a   :  { %2061 = vmatprep.subr.mxu0 %v2530_v0 }
  0x4b   :  { %2062 = vmatpush3.msra.mxu0 %v269_v17  ;;  %v501_v17 = vld [vmem:[#allocation2 + $0x290] sm:$0xff] }
  0x4c   :  { %2063 = vmatprep.subr.mxu0 %v2530_v0 }
  0x4d   :  { %2064 = vmatpush3.msra.mxu0 %v268_v18  ;;  %v500_v18 = vld [vmem:[#allocation2 + $0x288] sm:$0xff] }
  0x4e   :  { %2065 = vmatprep.subr.mxu0 %v2530_v0 }
  0x4f   :  { %2066 = vmatpush3.msra.mxu0 %v267_v19  ;;  %v499_v19 = vld [vmem:[#allocation2 + $0x280] sm:$0xff] }
  0x50   :  { %2105 = vmatprep.subr.mxu0 %v2530_v0 }
  0xef   :  { %v108_v34 = vpop.f32.mrf.mxu0 }
  0xf0   :  { %v112_v35 = vrot.slane %v108_v34, 4 }
  0xf1   :  { %v1999_v36 = vpop.f32.mrf.mxu0 }
  0xf2   :  { %v113_v37 = vadd.f32 %v112_v35, %v108_v34 }
  0xf4   :  { %v114_v38 = vrot.slane %v113_v37, 2 }
  0xf6   :  { %v115_v39 = vadd.f32 %v114_v38, %v113_v37 }
  0xf8   :  { %v116_v40 = vrot.slane %v115_v39, 1 }
  0xfa   :  { %v117_v41 = vadd.f32 %v116_v40, %v115_v39  ;;  %v249_v39 = vld [vmem:[#allocation2 + $0x108] sm:$0x1] }
  0xfc   :  { %v119_v42 = vmul.f32 0.125, %v117_v41 }
  0xfe   :  { %v120_v43 = vsub.f32 %v108_v34, %v119_v42 }
 0x100   :  { %v121_v44 = vmul.f32 %v120_v43, %v120_v43 }
 0x102   :  { %v122_v45 = vrot.slane %v121_v44, 4 }
 0x104   :  { %v123_v46 = vadd.f32 %v122_v45, %v121_v44 }
 0x106   :  { %v124_v47 = vrot.slane %v123_v46, 2 }
 0x108   :  { %v125_v48 = vadd.f32 %v124_v47, %v123_v46 }
 0x10a   :  { %v126_v49 = vrot.slane %v125_v48, 1 }
 0x10c   :  { %v127_v50 = vadd.f32 %v126_v49, %v125_v48 }
 0x10e   :  { %v128_v51 = vmul.f32 0.125, %v127_v50  ;;  %v1722_v50 = vld [vmem:[#allocation2 + $0x190] ss:$0 sm:$0xff] }
 0x110   :  { %v130_v52 = vadd.f32 1e-05, %v128_v51 }
 0x112   :  { %2460 = vrsqrt.f32 %v130_v52 }
 0x11f   :  { %v2461_v57 = vpop.eup %2460 }
 0x120   :  { %v132_v58 = vmul.f32 %v2461_v57, %v129_v55  ;;  %v381_v55 = vld [vmem:[#allocation2 + $0x208] sm:$0xff]  ;;  %v380_v57 = vld [vmem:[#allocation2 + $0x200] sm:$0xff] }
 0x122   :  { %v134_v60 = vmul.f32 %v132_v58, %v119_v42  ;;  %v139_v61 = vrot.slane %v132_v58, %v2593_v56  ;;  %v253_v42 = vld [vmem:[#allocation2 + $0x109] sm:$0x1]  ;;  %v379_v58 = vld [vmem:[#allocation2 + $0x1f8] sm:$0xff] }
 0x124   :  { %v135_v62 = vsub.f32 %v133_v59, %v134_v60  ;;  %v140_v63 = vmul.f32 %v139_v61, %v108_v34  ;;  %v378_v59 = vld [vmem:[#allocation2 + $0x1f0] sm:$0xff]  ;;  %v377_v60 = vld [vmem:[#allocation2 + $0x1e8] sm:$0xff]  ;;  %v376_v61 = vld [vmem:[#allocation2 + $0x1e0] sm:$0xff] }
 0x126   :  { %v144_v1 = vrot.slane %v135_v62, %v2593_v56  ;;  %v375_v62 = vld [vmem:[#allocation2 + $0x1d8] sm:$0xff] }
 0x128   :  { %v145_v2 = vadd.f32 %v144_v1, %v140_v63 }
 0x12a   :  { %v146_v3 = vmax.f32 %v145_v2, 0.0 }
 0x12c   :  { %2033 = vmatmul.mubr.f32.vlgmr.msra.gmra.mxu1 %v146_v3 }
 0x12d   :  { %2102 = vmatprep.mubr.msk.f32.mxu1 %vm2531_vm0, %v2530_v0  ;;  %2071 = vmatpush3.msra.mxu1 %v382_v54  ;;  %v473_v54 = vld [vmem:[#allocation2 + $0x219] sm:$0x1] }
 0x12e   :  { %2072 = vmatprep.subr.mxu1 %v2530_v0 }
 0x12f   :  { %2073 = vmatpush3.msra.mxu1 %v381_v55 }
 0x130   :  { %2074 = vmatprep.subr.mxu1 %v2530_v0 }
 0x131   :  { %2075 = vmatpush3.msra.mxu1 %v380_v57 }
 0x132   :  { %2076 = vmatprep.subr.mxu1 %v2530_v0 }
 0x133   :  { %2077 = vmatpush3.msra.mxu1 %v379_v58 }
 0x134   :  { %2078 = vmatprep.subr.mxu1 %v2530_v0 }
 0x135   :  { %2079 = vmatpush3.msra.mxu1 %v378_v59 }
 0x136   :  { %2080 = vmatprep.subr.mxu1 %v2530_v0 }
 0x137   :  { %2081 = vmatpush3.msra.mxu1 %v377_v60 }
 0x138   :  { %2082 = vmatprep.subr.mxu1 %v2530_v0 }
 0x139   :  { %2083 = vmatpush3.msra.mxu1 %v376_v61 }
 0x13a   :  { %2084 = vmatprep.subr.mxu1 %v2530_v0 }
 0x13b   :  { %2085 = vmatpush3.msra.mxu1 %v375_v62 }
 0x13c   :  { %2086 = vmatprep.subr.mxu1 %v2530_v0 }
 0x13d   :  { %2087 = vmatpush3.msra.mxu1 %v374_v4  ;;  %v747_v4 = vld [vmem:[#allocation2 + $0x388] sm:$0xff] }
 0x13e   :  { %2088 = vmatprep.subr.mxu1 %v2530_v0 }
 0x13f   :  { %2089 = vmatpush3.msra.mxu1 %v373_v5  ;;  %v746_v5 = vld [vmem:[#allocation2 + $0x380] sm:$0xff] }
 0x140   :  { %2090 = vmatprep.subr.mxu1 %v2530_v0 }
 0x141   :  { %2091 = vmatpush3.msra.mxu1 %v372_v6  ;;  %v745_v6 = vld [vmem:[#allocation2 + $0x378] sm:$0xff] }
 0x142   :  { %2092 = vmatprep.subr.mxu1 %v2530_v0 }
 0x143   :  { %2093 = vmatpush3.msra.mxu1 %v371_v7  ;;  %v744_v7 = vld [vmem:[#allocation2 + $0x370] sm:$0xff] }
 0x144   :  { %2094 = vmatprep.subr.mxu1 %v2530_v0 }
 0x145   :  { %2095 = vmatpush3.msra.mxu1 %v370_v8  ;;  %v743_v8 = vld [vmem:[#allocation2 + $0x368] sm:$0xff] }
 0x146   :  { %2096 = vmatprep.subr.mxu1 %v2530_v0 }
 0x147   :  { %2097 = vmatpush3.msra.mxu1 %v369_v9  ;;  %v742_v9 = vld [vmem:[#allocation2 + $0x360] sm:$0xff] }
 0x148   :  { %2098 = vmatprep.subr.mxu1 %v2530_v0 }
 0x149   :  { %2099 = vmatpush3.msra.mxu1 %v368_v10  ;;  %v741_v10 = vld [vmem:[#allocation2 + $0x358] sm:$0xff] }
 0x14a   :  { %2100 = vmatprep.subr.mxu1 %v2530_v0 }
 0x14b   :  { %2101 = vmatpush3.msra.mxu1 %v367_v11  ;;  %v740_v11 = vld [vmem:[#allocation2 + $0x350] sm:$0xff] }
 0x14c   :  { %2140 = vmatprep.subr.mxu1 %v2530_v0 }
 0x1ec   :  { %v229_v20 = vpop.f32.mrf.mxu1 }
 0x1ed   :  { %v233_v21 = vrot.slane %v229_v20, 4 }
 0x1ee   :  { %v2034_v22 = vpop.f32.mrf.mxu1 }
 0x1ef   :  { %v234_v23 = vadd.f32 %v233_v21, %v229_v20  ;;  %v497_v21 = vld [vmem:[#allocation2 + $0x270] sm:$0xff]  ;;  %v496_v22 = vld [vmem:[#allocation2 + $0x268] sm:$0xff] }
 0x1f1   :  { %v235_v24 = vrot.slane %v234_v23, 2 }
 0x1f3   :  { %v236_v25 = vadd.f32 %v235_v24, %v234_v23  ;;  %v495_v23 = vld [vmem:[#allocation2 + $0x260] sm:$0xff]  ;;  %v494_v24 = vld [vmem:[#allocation2 + $0x258] sm:$0xff] }
 0x1f5   :  { %v237_v26 = vrot.slane %v236_v25, 1 }
 0x1f7   :  { %v238_v27 = vadd.f32 %v237_v26, %v236_v25  ;;  %v493_v25 = vld [vmem:[#allocation2 + $0x250] sm:$0xff]  ;;  %v492_v26 = vld [vmem:[#allocation2 + $0x248] sm:$0xff] }
 0x1f9   :  { %v239_v28 = vmul.f32 0.125, %v238_v27  ;;  %v491_v27 = vld [vmem:[#allocation2 + $0x240] sm:$0xff] }
 0x1fb   :  { %v240_v29 = vsub.f32 %v229_v20, %v239_v28 }
 0x1fd   :  { %v241_v30 = vmul.f32 %v240_v29, %v240_v29  ;;  %v489_v29 = vld [vmem:[#allocation2 + $0x230] sm:$0xff] }
 0x1ff   :  { %v242_v31 = vrot.slane %v241_v30, 4 }
 0x201   :  { %v243_v32 = vadd.f32 %v242_v31, %v241_v30  ;;  %v488_v30 = vld [vmem:[#allocation2 + $0x228] sm:$0xff]  ;;  %v487_v31 = vld [vmem:[#allocation2 + $0x220] sm:$0xff] }
 0x203   :  { %v244_v33 = vrot.slane %v243_v32, 2 }
 0x205   :  { %v245_v34 = vadd.f32 %v244_v33, %v243_v32 }
 0x207   :  { %v246_v35 = vrot.slane %v245_v34, 1 }
 0x209   :  { %v247_v36 = vadd.f32 %v246_v35, %v245_v34 }
 0x20b   :  { %v248_v37 = vmul.f32 0.125, %v247_v36 }
 0x20d   :  { %v250_v38 = vadd.f32 1e-05, %v248_v37 }
 0x20f   :  { %2462 = vrsqrt.f32 %v250_v38 }
 0x21c   :  { %v2463_v40 = vpop.eup %2462 }
 0x21d   :  { %v252_v41 = vmul.f32 %v2463_v40, %v249_v39 }
 0x21f   :  { %v254_v43 = vmul.f32 %v252_v41, %v239_v28  ;;  %v259_v44 = vrot.slane %v252_v41, %v2593_v56  ;;  %v490_v28 = vld [vmem:[#allocation2 + $0x238] sm:$0xff] }
 0x221   :  { %v255_v45 = vsub.f32 %v253_v42, %v254_v43  ;;  %v260_v46 = vmul.f32 %v259_v44, %v229_v20  ;;  %v498_v20 = vld [vmem:[#allocation2 + $0x278] sm:$0xff] }
 0x223   :  { %v264_v47 = vrot.slane %v255_v45, %v2593_v56 }
 0x225   :  { %v265_v48 = vadd.f32 %v264_v47, %v260_v46 }
 0x227   :  { %v266_v49 = vmax.f32 %v265_v48, 0.0 }
 0x229   :  { %2068 = vmatmul.mubr.f32.vlgmr.msra.gmra.mxu0 %v266_v49 }
 0x22a   :  { %2137 = vmatprep.mubr.msk.f32.mxu0 %vm2531_vm0, %v2530_v0  ;;  %2106 = vmatpush3.msra.mxu0 %v502_v16  ;;  %v735_v16 = vld [vmem:[%s2856_s0 + $0x8] sm:$0xff] }
 0x22b   :  { %2107 = vmatprep.subr.mxu0 %v2530_v0 }
 0x22c   :  { %2108 = vmatpush3.msra.mxu0 %v501_v17  ;;  %v622_v17 = vld [vmem:[#allocation2 + $0x320] sm:$0xff] }
 0x22d   :  { %2109 = vmatprep.subr.mxu0 %v2530_v0 }
 0x22e   :  { %2110 = vmatpush3.msra.mxu0 %v500_v18  ;;  %v621_v18 = vld [vmem:[#allocation2 + $0x318] sm:$0xff] }
 0x22f   :  { %2111 = vmatprep.subr.mxu0 %v2530_v0 }
 0x230   :  { %2112 = vmatpush3.msra.mxu0 %v499_v19  ;;  %v620_v19 = vld [vmem:[#allocation2 + $0x310] sm:$0xff] }
 0x231   :  { %2113 = vmatprep.subr.mxu0 %v2530_v0 }
 0x232   :  { %2114 = vmatpush3.msra.mxu0 %v498_v20  ;;  %v619_v20 = vld [vmem:[#allocation2 + $0x308] sm:$0xff] }
 0x233   :  { %2115 = vmatprep.subr.mxu0 %v2530_v0 }
 0x234   :  { %2116 = vmatpush3.msra.mxu0 %v497_v21  ;;  %v618_v21 = vld [vmem:[#allocation2 + $0x300] sm:$0xff] }
 0x235   :  { %2117 = vmatprep.subr.mxu0 %v2530_v0 }
 0x236   :  { %2118 = vmatpush3.msra.mxu0 %v496_v22  ;;  %v617_v22 = vld [vmem:[#allocation2 + $0x2f8] sm:$0xff] }
 0x237   :  { %2119 = vmatprep.subr.mxu0 %v2530_v0 }
 0x238   :  { %2120 = vmatpush3.msra.mxu0 %v495_v23  ;;  %v616_v23 = vld [vmem:[#allocation2 + $0x2f0] sm:$0xff] }
 0x239   :  { %2121 = vmatprep.subr.mxu0 %v2530_v0 }
 0x23a   :  { %2122 = vmatpush3.msra.mxu0 %v494_v24  ;;  %v615_v24 = vld [vmem:[#allocation2 + $0x2e8] sm:$0xff] }
 0x23b   :  { %2123 = vmatprep.subr.mxu0 %v2530_v0 }
 0x23c   :  { %2124 = vmatpush3.msra.mxu0 %v493_v25  ;;  %v614_v25 = vld [vmem:[#allocation2 + $0x2e0] sm:$0xff] }
 0x23d   :  { %2125 = vmatprep.subr.mxu0 %v2530_v0 }
 0x23e   :  { %2126 = vmatpush3.msra.mxu0 %v492_v26  ;;  %v613_v26 = vld [vmem:[#allocation2 + $0x2d8] sm:$0xff] }
 0x23f   :  { %2127 = vmatprep.subr.mxu0 %v2530_v0 }
 0x240   :  { %2128 = vmatpush3.msra.mxu0 %v491_v27  ;;  %v612_v27 = vld [vmem:[#allocation2 + $0x2d0] sm:$0xff] }
 0x241   :  { %2129 = vmatprep.subr.mxu0 %v2530_v0 }
 0x242   :  { %2130 = vmatpush3.msra.mxu0 %v490_v28  ;;  %v611_v28 = vld [vmem:[#allocation2 + $0x2c8] sm:$0xff] }
 0x243   :  { %2131 = vmatprep.subr.mxu0 %v2530_v0 }
 0x244   :  { %2132 = vmatpush3.msra.mxu0 %v489_v29  ;;  %v610_v29 = vld [vmem:[#allocation2 + $0x2c0] sm:$0xff] }
 0x245   :  { %2133 = vmatprep.subr.mxu0 %v2530_v0 }
 0x246   :  { %2134 = vmatpush3.msra.mxu0 %v488_v30  ;;  %v609_v30 = vld [vmem:[#allocation2 + $0x2b8] sm:$0xff] }
 0x247   :  { %2135 = vmatprep.subr.mxu0 %v2530_v0 }
 0x248   :  { %2136 = vmatpush3.msra.mxu0 %v487_v31  ;;  %v608_v31 = vld [vmem:[#allocation2 + $0x2b0] sm:$0xff] }
 0x249   :  { %2175 = vmatprep.subr.mxu0 %v2530_v0 }
 0x2e9   :  { %v354_v51 = vpop.f32.mrf.mxu0 }
 0x2ea   :  { %v355_v52 = vadd.f32 %v1722_v50, %v354_v51  ;;  %v469_v51 = vld [vmem:[#allocation2 + $0x218] sm:$0x1] }
 0x2eb   :  { %v2069_v53 = vpop.f32.mrf.mxu0 }
 0x2ec   :  { %358 = vmax.xlane.f32.xlu0 %v355_v52 }
 0x375   :  { %v359_v63 = vpop.xlane.xlu0 %358 }
 0x376   :  { %v360_v1 = vsub.f32 %v355_v52, %v359_v63  ;;  %v751_v63 = vld [vmem:[#allocation2 + $0x3a8] sm:$0xff] }
 0x378   :  { %v361_v2 = vmul.f32 1.442695, %v360_v1  ;;  %v750_v1 = vld [vmem:[#allocation2 + $0x3a0] sm:$0xff] }
 0x37a   :  { %2464 = vpow2.f32 %v361_v2  ;;  %v749_v2 = vld [vmem:[#allocation2 + $0x398] sm:$0xff] }
 0x387   :  { %v2465_v3 = vpop.eup %2464 }
 0x388   :  { %363 = vadd.xlane.f32.xlu0 %v2465_v3 }
 0x411   :  { %v364_v12 = vpop.xlane.xlu0 %363 }
 0x412   :  { %2466 = vrcp.f32 %v364_v12  ;;  %v739_v12 = vld [vmem:[#allocation2 + $0x348] sm:$0xff] }
 0x41f   :  { %v2467_v13 = vpop.eup %2466 }
 0x420   :  { %v366_v14 = vmul.f32 %v2467_v13, %v2465_v3  ;;  %v748_v3 = vld [vmem:[#allocation2 + $0x390] sm:$0xff]  ;;  %v738_v13 = vld [vmem:[#allocation2 + $0x340] sm:$0xff] }
 0x422   :  { %2103 = vmatmul.mubr.f32.vlgmr.msra.gmra.mxu1 %v366_v14  ;;  %728 = vst [vmem:[%s2858_s2 + $0x8] sm:$0xff] %v366_v14  ;;  %v729_v15 = vmul.f32 %v366_v14, %v366_v14  ;;  %v737_v14 = vld [vmem:[#allocation2 + $0x338] sm:$0xff] }
 0x423   :  { %2172 = vmatprep.mubr.msk.f32.mxu1 %vm2531_vm0, %v2530_v0  ;;  %2141 = vmatpush3.msra.mxu1 %v622_v17  ;;  %v871_v17 = vld [vmem:[#allocation2 + $0x430] sm:$0xff] }
 0x424   :  { %730 = vadd.xlane.f32.xlu0 %v729_v15  ;;  %v736_v15 = vld [vmem:[#allocation2 + $0x330] sm:$0xff]  ;;  %2142 = vmatprep.subr.mxu1 %v2530_v0 }
 0x425   :  { %2143 = vmatpush3.msra.mxu1 %v621_v18 }
 0x426   :  { %2144 = vmatprep.subr.mxu1 %v2530_v0 }
 0x427   :  { %2145 = vmatpush3.msra.mxu1 %v620_v19  ;;  %v870_v19 = vld [vmem:[#allocation2 + $0x428] sm:$0xff] }
 0x428   :  { %2146 = vmatprep.subr.mxu1 %v2530_v0 }
 0x429   :  { %2147 = vmatpush3.msra.mxu1 %v619_v20 }
 0x42a   :  { %2148 = vmatprep.subr.mxu1 %v2530_v0 }
 0x42b   :  { %2149 = vmatpush3.msra.mxu1 %v618_v21  ;;  %v869_v21 = vld [vmem:[#allocation2 + $0x420] sm:$0xff] }
 0x42c   :  { %2150 = vmatprep.subr.mxu1 %v2530_v0 }
 0x42d   :  { %2151 = vmatpush3.msra.mxu1 %v617_v22 }
 0x42e   :  { %2152 = vmatprep.subr.mxu1 %v2530_v0 }
 0x42f   :  { %2153 = vmatpush3.msra.mxu1 %v616_v23  ;;  %v868_v23 = vld [vmem:[#allocation2 + $0x418] sm:$0xff] }
 0x430   :  { %2154 = vmatprep.subr.mxu1 %v2530_v0 }
 0x431   :  { %2155 = vmatpush3.msra.mxu1 %v615_v24  ;;  %v867_v24 = vld [vmem:[#allocation2 + $0x410] sm:$0xff] }
 0x432   :  { %2156 = vmatprep.subr.mxu1 %v2530_v0 }
 0x433   :  { %2157 = vmatpush3.msra.mxu1 %v614_v25  ;;  %v866_v25 = vld [vmem:[#allocation2 + $0x408] sm:$0xff] }
 0x434   :  { %2158 = vmatprep.subr.mxu1 %v2530_v0 }
 0x435   :  { %2159 = vmatpush3.msra.mxu1 %v613_v26  ;;  %v865_v26 = vld [vmem:[#allocation2 + $0x400] sm:$0xff] }
 0x436   :  { %2160 = vmatprep.subr.mxu1 %v2530_v0 }
 0x437   :  { %2161 = vmatpush3.msra.mxu1 %v612_v27  ;;  %v864_v27 = vld [vmem:[#allocation2 + $0x3f8] sm:$0xff] }
 0x438   :  { %2162 = vmatprep.subr.mxu1 %v2530_v0 }
 0x439   :  { %2163 = vmatpush3.msra.mxu1 %v611_v28  ;;  %v863_v28 = vld [vmem:[#allocation2 + $0x3f0] sm:$0xff] }
 0x43a   :  { %2164 = vmatprep.subr.mxu1 %v2530_v0 }
 0x43b   :  { %2165 = vmatpush3.msra.mxu1 %v610_v29  ;;  %v862_v29 = vld [vmem:[#allocation2 + $0x3e8] sm:$0xff] }
 0x43c   :  { %2166 = vmatprep.subr.mxu1 %v2530_v0 }
 0x43d   :  { %2167 = vmatpush3.msra.mxu1 %v609_v30  ;;  %v838_v30 = vld [vmem:[#allocation2 + $0x3b0] sm:$0x1] }
 0x43e   :  { %2168 = vmatprep.subr.mxu1 %v2530_v0 }
 0x43f   :  { %2169 = vmatpush3.msra.mxu1 %v608_v31  ;;  %v861_v31 = vld [vmem:[#allocation2 + $0x3e0] sm:$0xff] }
 0x440   :  { %2170 = vmatprep.subr.mxu1 %v2530_v0 }
 0x4e2   :  { %v449_v32 = vpop.f32.mrf.mxu1 }
 0x4e3   :  { %v453_v33 = vrot.slane %v449_v32, 4 }
 0x4e4   :  { %v2104_v34 = vpop.f32.mrf.mxu1 }
 0x4e5   :  { %v454_v35 = vadd.f32 %v453_v33, %v449_v32 }
 0x4e7   :  { %v455_v36 = vrot.slane %v454_v35, 2 }
 0x4e9   :  { %v456_v37 = vadd.f32 %v455_v36, %v454_v35 }
 0x4eb   :  { %v457_v38 = vrot.slane %v456_v37, 1 }
 0x4ed   :  { %v458_v39 = vadd.f32 %v457_v38, %v456_v37 }
 0x4ef   :  { %v459_v40 = vmul.f32 0.125, %v458_v39 }
 0x4f1   :  { %v460_v41 = vsub.f32 %v449_v32, %v459_v40 }
 0x4f3   :  { %v461_v42 = vmul.f32 %v460_v41, %v460_v41 }
 0x4f5   :  { %v462_v43 = vrot.slane %v461_v42, 4 }
 0x4f7   :  { %v463_v44 = vadd.f32 %v462_v43, %v461_v42 }
 0x4f9   :  { %v464_v45 = vrot.slane %v463_v44, 2 }
 0x4fb   :  { %v465_v46 = vadd.f32 %v464_v45, %v463_v44 }
 0x4fd   :  { %v466_v47 = vrot.slane %v465_v46, 1 }
 0x4ff   :  { %v467_v48 = vadd.f32 %v466_v47, %v465_v46 }
 0x501   :  { %v468_v49 = vmul.f32 0.125, %v467_v48 }
 0x503   :  { %v470_v50 = vadd.f32 1e-05, %v468_v49 }
 0x505   :  { %2468 = vrsqrt.f32 %v470_v50 }
 0x512   :  { %v2469_v52 = vpop.eup %2468 }
 0x513   :  { %v472_v53 = vmul.f32 %v2469_v52, %v469_v51 }
 0x515   :  { %v474_v55 = vmul.f32 %v472_v53, %v459_v40  ;;  %v479_v57 = vrot.slane %v472_v53, %v2593_v56 }
 0x517   :  { %v475_v58 = vsub.f32 %v473_v54, %v474_v55  ;;  %v480_v59 = vmul.f32 %v479_v57, %v449_v32  ;;  %v607_v32 = vld [vmem:[#allocation2 + $0x2a8] sm:$0xff] }
 0x518   :  { %2171 = vmatpush3.msra.mxu1 %v607_v32 }
 0x519   :  { %v484_v60 = vrot.slane %v475_v58, %v2593_v56  ;;  %2210 = vmatprep.subr.mxu1 %v2530_v0 }
 0x51b   :  { %v485_v61 = vadd.f32 %v484_v60, %v480_v59 }
 0x51d   :  { %v486_v62 = vmax.f32 %v485_v61, 0.0 }
 0x51f   :  { %2138 = vmatmul.mubr.f32.vlgmr.msra.gmra.mxu0 %v486_v62  ;;  %v589_v62 = vld [vmem:[#allocation2 + $0x2a0] sm:$0x1] }
 0x520   :  { %2176 = vmatpush3.msra.mxu0 %v751_v63  ;;  %2207 = vmatprep.mubr.msk.f32.mxu0 %vm2531_vm0, %v2530_v0 }
 0x521   :  { %2177 = vmatprep.subr.mxu0 %v2530_v0 }
 0x522   :  { %2178 = vmatpush3.msra.mxu0 %v750_v1 }
 0x523   :  { %2179 = vmatprep.subr.mxu0 %v2530_v0 }
 0x524   :  { %2180 = vmatpush3.msra.mxu0 %v749_v2 }
 0x525   :  { %2181 = vmatprep.subr.mxu0 %v2530_v0 }
 0x526   :  { %2182 = vmatpush3.msra.mxu0 %v748_v3 }
 0x527   :  { %2183 = vmatprep.subr.mxu0 %v2530_v0 }
 0x528   :  { %2184 = vmatpush3.msra.mxu0 %v747_v4  ;;  %v593_v4 = vld [vmem:[#allocation2 + $0x2a1] sm:$0x1] }
 0x529   :  { %2185 = vmatprep.subr.mxu0 %v2530_v0 }
 0x52a   :  { %2186 = vmatpush3.msra.mxu0 %v746_v5 }
 0x52b   :  { %2187 = vmatprep.subr.mxu0 %v2530_v0 }
 0x52c   :  { %2188 = vmatpush3.msra.mxu0 %v745_v6 }
 0x52d   :  { %2189 = vmatprep.subr.mxu0 %v2530_v0 }
 0x52e   :  { %2190 = vmatpush3.msra.mxu0 %v744_v7 }
 0x52f   :  { %2191 = vmatprep.subr.mxu0 %v2530_v0 }
 0x530   :  { %2192 = vmatpush3.msra.mxu0 %v743_v8 }
 0x531   :  { %2193 = vmatprep.subr.mxu0 %v2530_v0 }
 0x532   :  { %2194 = vmatpush3.msra.mxu0 %v742_v9 }
 0x533   :  { %2195 = vmatprep.subr.mxu0 %v2530_v0 }
 0x534   :  { %2196 = vmatpush3.msra.mxu0 %v741_v10 }
 0x535   :  { %2197 = vmatprep.subr.mxu0 %v2530_v0 }
 0x536   :  { %2198 = vmatpush3.msra.mxu0 %v740_v11 }
 0x537   :  { %2199 = vmatprep.subr.mxu0 %v2530_v0 }
 0x538   :  { %2200 = vmatpush3.msra.mxu0 %v739_v12 }
 0x539   :  { %2201 = vmatprep.subr.mxu0 %v2530_v0 }
 0x53a   :  { %2202 = vmatpush3.msra.mxu0 %v738_v13 }
 0x53b   :  { %2203 = vmatprep.subr.mxu0 %v2530_v0 }
 0x53c   :  { %2204 = vmatpush3.msra.mxu0 %v737_v14 }
 0x53d   :  { %2205 = vmatprep.subr.mxu0 %v2530_v0 }
 0x53e   :  { %2206 = vmatpush3.msra.mxu0 %v736_v15 }
 0x53f   :  { %2208 = vmatmul.mubr.f32.vlgmr.msra.gmra.mxu0 %v735_v16  ;;  %2245 = vmatprep.subr.mxu0 %v2530_v0 }
 0x540   :  { %2277 = vmatprep.mubr.msk.f32.mxu0 %vm2531_vm0, %v2530_v0 }
 0x5df   :  { %v569_v33 = vpop.f32.mrf.mxu0 }
 0x5e0   :  { %v573_v34 = vrot.slane %v569_v33, 4 }
 0x5e1   :  { %v2139_v35 = vpop.f32.mrf.mxu0 }
 0x5e2   :  { %v574_v36 = vadd.f32 %v573_v34, %v569_v33  ;;  %v860_v34 = vld [vmem:[#allocation2 + $0x3d8] sm:$0xff]  ;;  %v842_v35 = vld [vmem:[#allocation2 + $0x3b1] sm:$0x1] }
 0x5e4   :  { %v575_v37 = vrot.slane %v574_v36, 2 }
 0x5e6   :  { %v576_v38 = vadd.f32 %v575_v37, %v574_v36 }
 0x5e8   :  { %v577_v39 = vrot.slane %v576_v38, 1 }
 0x5ea   :  { %v578_v40 = vadd.f32 %v577_v39, %v576_v38  ;;  %v859_v38 = vld [vmem:[#allocation2 + $0x3d0] sm:$0xff] }
 0x5ec   :  { %v579_v41 = vmul.f32 0.125, %v578_v40  ;;  %v858_v40 = vld [vmem:[#allocation2 + $0x3c8] sm:$0xff] }
 0x5ee   :  { %v580_v42 = vsub.f32 %v569_v33, %v579_v41 }
 0x5f0   :  { %v581_v43 = vmul.f32 %v580_v42, %v580_v42 }
 0x5f2   :  { %v582_v44 = vrot.slane %v581_v43, 4 }
 0x5f4   :  { %v583_v45 = vadd.f32 %v582_v44, %v581_v43  ;;  %v857_v43 = vld [vmem:[#allocation2 + $0x3c0] sm:$0xff] }
 0x5f6   :  { %v584_v46 = vrot.slane %v583_v45, 2 }
 0x5f8   :  { %v585_v47 = vadd.f32 %v584_v46, %v583_v45  ;;  %v856_v45 = vld [vmem:[#allocation2 + $0x3b8] sm:$0xff] }
 0x5fa   :  { %v586_v48 = vrot.slane %v585_v47, 1 }
 0x5fc   :  { %v587_v49 = vadd.f32 %v586_v48, %v585_v47  ;;  %v991_v47 = vld [vmem:[#allocation2 + $0x4b8] sm:$0xff]  ;;  %v990_v48 = vld [vmem:[#allocation2 + $0x4b0] sm:$0xff] }
 0x5fd   :  { %2246 = vmatpush3.msra.mxu0 %v991_v47 }
 0x5fe   :  { %v588_v50 = vmul.f32 0.125, %v587_v49  ;;  %2247 = vmatprep.subr.mxu0 %v2530_v0  ;;  %v989_v49 = vld [vmem:[#allocation2 + $0x4a8] sm:$0xff] }
 0x5ff   :  { %v2697_v51 = vpop.f32.mrf.mxu0  ;;  %2248 = vmatpush3.msra.mxu0 %v990_v48 }
 0x600   :  { %v590_v52 = vadd.f32 1e-05, %v588_v50  ;;  %v822_v53 = vrot.slane %v2697_v51, 4  ;;  %2249 = vmatprep.subr.mxu0 %v2530_v0  ;;  %v988_v50 = vld [vmem:[#allocation2 + $0x4a0] sm:$0xff] }
 0x601   :  { %v2209_v54 = vpop.f32.mrf.mxu0  ;;  %2250 = vmatpush3.msra.mxu0 %v989_v49 }
 0x602   :  { %2470 = vrsqrt.f32 %v590_v52  ;;  %v823_v55 = vadd.f32 %v822_v53, %v2697_v51  ;;  %2251 = vmatprep.subr.mxu0 %v2530_v0  ;;  %v986_v52 = vld [vmem:[#allocation2 + $0x490] sm:$0xff]  ;;  %v985_v53 = vld [vmem:[#allocation2 + $0x488] sm:$0xff]  ;;  %v984_v54 = vld [vmem:[#allocation2 + $0x480] sm:$0xff] }
 0x603   :  { %2252 = vmatpush3.msra.mxu0 %v988_v50  ;;  %v958_v50 = vld [vmem:[#allocation2 + $0x438] sm:$0x1] }
 0x604   :  { %v824_v57 = vrot.slane %v823_v55, 2  ;;  %2253 = vmatprep.subr.mxu0 %v2530_v0 }
 0x606   :  { %v825_v58 = vadd.f32 %v824_v57, %v823_v55  ;;  %v983_v55 = vld [vmem:[#allocation2 + $0x478] sm:$0xff]  ;;  %v982_v57 = vld [vmem:[#allocation2 + $0x470] sm:$0xff] }
 0x608   :  { %v826_v59 = vrot.slane %v825_v58, 1 }
 0x60a   :  { %v827_v60 = vadd.f32 %v826_v59, %v825_v58  ;;  %v981_v58 = vld [vmem:[#allocation2 + $0x468] sm:$0xff]  ;;  %v980_v59 = vld [vmem:[#allocation2 + $0x460] sm:$0xff] }
 0x60c   :  { %v828_v61 = vmul.f32 0.125, %v827_v60  ;;  %v979_v60 = vld [vmem:[#allocation2 + $0x458] sm:$0xff] }
 0x60e   :  { %v829_v63 = vsub.f32 %v2697_v51, %v828_v61 }
 0x60f   :  { %v2471_v1 = vpop.eup %2470 }
 0x610   :  { %v592_v2 = vmul.f32 %v2471_v1, %v589_v62  ;;  %v830_v3 = vmul.f32 %v829_v63, %v829_v63  ;;  %v977_v62 = vld [vmem:[#allocation2 + $0x448] sm:$0xff]  ;;  %v976_v63 = vld [vmem:[#allocation2 + $0x440] sm:$0xff] }
 0x612   :  { %v594_v5 = vmul.f32 %v592_v2, %v579_v41  ;;  %v599_v6 = vrot.slane %v592_v2, %v2593_v56  ;;  %v831_v7 = vrot.slane %v830_v3, 4 }
 0x614   :  { %v595_v8 = vsub.f32 %v593_v4, %v594_v5  ;;  %v832_v9 = vadd.f32 %v831_v7, %v830_v3  ;;  %v600_v10 = vmul.f32 %v599_v6, %v569_v33 }
 0x616   :  { %v604_v11 = vrot.slane %v595_v8, %v2593_v56  ;;  %v833_v12 = vrot.slane %v832_v9, 2 }
 0x618   :  { %v605_v13 = vadd.f32 %v604_v11, %v600_v10  ;;  %v834_v14 = vadd.f32 %v833_v12, %v832_v9 }
 0x61a   :  { %v835_v15 = vrot.slane %v834_v14, 1  ;;  %v606_v16 = vmax.f32 %v605_v13, 0.0 }
 0x61c   :  { %v836_v18 = vadd.f32 %v835_v15, %v834_v14  ;;  %2173 = vmatmul.mubr.f32.vlgmr.msra.gmra.mxu1 %v606_v16 }
 0x61d   :  { %2211 = vmatpush3.msra.mxu1 %v871_v17  ;;  %2242 = vmatprep.mubr.msk.f32.mxu1 %vm2531_vm0, %v2530_v0 }
 0x61e   :  { %v837_v20 = vmul.f32 0.125, %v836_v18  ;;  %2212 = vmatprep.subr.mxu1 %v2530_v0 }
 0x61f   :  { %2213 = vmatpush3.msra.mxu1 %v870_v19 }
 0x620   :  { %v839_v22 = vadd.f32 1e-05, %v837_v20  ;;  %2214 = vmatprep.subr.mxu1 %v2530_v0 }
 0x621   :  { %2215 = vmatpush3.msra.mxu1 %v869_v21 }
 0x622   :  { %2472 = vrsqrt.f32 %v839_v22  ;;  %2216 = vmatprep.subr.mxu1 %v2530_v0 }
 0x623   :  { %2217 = vmatpush3.msra.mxu1 %v868_v23 }
 0x624   :  { %2218 = vmatprep.subr.mxu1 %v2530_v0 }
 0x625   :  { %2219 = vmatpush3.msra.mxu1 %v867_v24 }
 0x626   :  { %2220 = vmatprep.subr.mxu1 %v2530_v0 }
 0x627   :  { %2221 = vmatpush3.msra.mxu1 %v866_v25 }
 0x628   :  { %2222 = vmatprep.subr.mxu1 %v2530_v0 }
 0x629   :  { %2223 = vmatpush3.msra.mxu1 %v865_v26 }
 0x62a   :  { %2224 = vmatprep.subr.mxu1 %v2530_v0 }
 0x62b   :  { %2225 = vmatpush3.msra.mxu1 %v864_v27 }
 0x62c   :  { %2226 = vmatprep.subr.mxu1 %v2530_v0 }
 0x62d   :  { %2227 = vmatpush3.msra.mxu1 %v863_v28 }
 0x62e   :  { %2228 = vmatprep.subr.mxu1 %v2530_v0 }
 0x62f   :  { %v2473_v32 = vpop.eup %2472  ;;  %2229 = vmatpush3.msra.mxu1 %v862_v29  ;;  %v709_v29 = vld [vmem:[#allocation2 + $0x328] sm:$0x1] }
 0x630   :  { %v841_v33 = vmul.f32 %v2473_v32, %v838_v30  ;;  %2230 = vmatprep.subr.mxu1 %v2530_v0 }
 0x631   :  { %2231 = vmatpush3.msra.mxu1 %v861_v31 }
 0x632   :  { %v843_v36 = vmul.f32 %v841_v33, %v828_v61  ;;  %v848_v37 = vrot.slane %v841_v33, %v2593_v56  ;;  %2232 = vmatprep.subr.mxu1 %v2530_v0  ;;  %v978_v61 = vld [vmem:[#allocation2 + $0x450] sm:$0xff] }
 0x633   :  { %2233 = vmatpush3.msra.mxu1 %v860_v34  ;;  %v713_v34 = vld [vmem:[#allocation2 + $0x329] sm:$0x1] }
 0x634   :  { %v844_v39 = vsub.f32 %v842_v35, %v843_v36  ;;  %2234 = vmatprep.subr.mxu1 %v2530_v0  ;;  %v849_v41 = vmul.f32 %v848_v37, %v2697_v51  ;;  %v987_v51 = vld [vmem:[#allocation2 + $0x498] sm:$0xff] }
 0x635   :  { %2235 = vmatpush3.msra.mxu1 %v859_v38  ;;  %2254 = vmatpush3.msra.mxu0 %v987_v51 }
 0x636   :  { %v853_v42 = vrot.slane %v844_v39, %v2593_v56  ;;  %2236 = vmatprep.subr.mxu1 %v2530_v0  ;;  %2255 = vmatprep.subr.mxu0 %v2530_v0 }
 0x637   :  { %2237 = vmatpush3.msra.mxu1 %v858_v40  ;;  %2256 = vmatpush3.msra.mxu0 %v986_v52 }
 0x638   :  { %v854_v44 = vadd.f32 %v853_v42, %v849_v41  ;;  %2238 = vmatprep.subr.mxu1 %v2530_v0  ;;  %2257 = vmatprep.subr.mxu0 %v2530_v0 }
 0x639   :  { %2239 = vmatpush3.msra.mxu1 %v857_v43  ;;  %2258 = vmatpush3.msra.mxu0 %v985_v53  ;;  %v962_v53 = vld [vmem:[#allocation2 + $0x439] sm:$0x1] }
 0x63a   :  { %2240 = vmatprep.subr.mxu1 %v2530_v0  ;;  %v855_v46 = vmax.f32 %v854_v44, 0.0  ;;  %2259 = vmatprep.subr.mxu0 %v2530_v0 }
 0x63b   :  { %2241 = vmatpush3.msra.mxu1 %v856_v45  ;;  %2260 = vmatpush3.msra.mxu0 %v984_v54 }
 0x63c   :  { %2243 = vmatmul.mubr.f32.vlgmr.msra.gmra.mxu1 %v855_v46  ;;  %2280 = vmatprep.subr.mxu1 %v2530_v0 }
 0x63d   :  { %2312 = vmatprep.mubr.msk.f32.mxu1 %vm2531_vm0, %v2530_v0  ;;  %2261 = vmatprep.subr.mxu0 %v2530_v0 }
 0x63e   :  { %2262 = vmatpush3.msra.mxu0 %v983_v55 }
 0x63f   :  { %2263 = vmatprep.subr.mxu0 %v2530_v0 }
 0x640   :  { %2264 = vmatpush3.msra.mxu0 %v982_v57 }
 0x641   :  { %2265 = vmatprep.subr.mxu0 %v2530_v0 }
 0x642   :  { %2266 = vmatpush3.msra.mxu0 %v981_v58 }
 0x643   :  { %2267 = vmatprep.subr.mxu0 %v2530_v0 }
 0x644   :  { %2268 = vmatpush3.msra.mxu0 %v980_v59 }
 0x645   :  { %2269 = vmatprep.subr.mxu0 %v2530_v0 }
 0x646   :  { %2270 = vmatpush3.msra.mxu0 %v979_v60 }
 0x647   :  { %2271 = vmatprep.subr.mxu0 %v2530_v0 }
 0x648   :  { %2272 = vmatpush3.msra.mxu0 %v978_v61 }
 0x649   :  { %2273 = vmatprep.subr.mxu0 %v2530_v0 }
 0x64a   :  { %2274 = vmatpush3.msra.mxu0 %v977_v62  ;;  %v1723_v62 = vld [vmem:[#allocation2 + $0x4c0] ss:$0 sm:$0xff] }
 0x64b   :  { %2275 = vmatprep.subr.mxu0 %v2530_v0 }
 0x64c   :  { %2276 = vmatpush3.msra.mxu0 %v976_v63 }
 0x64d   :  { %2315 = vmatprep.subr.mxu0 %v2530_v0 }
 0x6dc   :  { %v689_v1 = vpop.f32.mrf.mxu1 }
 0x6dd   :  { %v693_v2 = vrot.slane %v689_v1, 4 }
 0x6de   :  { %v2174_v3 = vpop.f32.mrf.mxu1 }
 0x6df   :  { %v694_v4 = vadd.f32 %v693_v2, %v689_v1  ;;  %v1091_v3 = vld [vmem:[#allocation2 + $0x540] sm:$0xff] }
 0x6e0   :  { %2281 = vmatpush3.msra.mxu1 %v1091_v3  ;;  %v1178_v3 = vld [vmem:[#allocation2 + $0x548] sm:$0x1] }
 0x6e1   :  { %v695_v5 = vrot.slane %v694_v4, 2  ;;  %2282 = vmatprep.subr.mxu1 %v2530_v0 }
 0x6e3   :  { %v696_v6 = vadd.f32 %v695_v5, %v694_v4  ;;  %v1090_v4 = vld [vmem:[#allocation2 + $0x538] sm:$0xff]  ;;  %v1089_v5 = vld [vmem:[#allocation2 + $0x530] sm:$0xff] }
 0x6e4   :  { %2283 = vmatpush3.msra.mxu1 %v1090_v4 }
 0x6e5   :  { %v697_v7 = vrot.slane %v696_v6, 1  ;;  %2284 = vmatprep.subr.mxu1 %v2530_v0 }
 0x6e6   :  { %2285 = vmatpush3.msra.mxu1 %v1089_v5 }
 0x6e7   :  { %v698_v8 = vadd.f32 %v697_v7, %v696_v6  ;;  %v1088_v6 = vld [vmem:[#allocation2 + $0x528] sm:$0xff]  ;;  %2286 = vmatprep.subr.mxu1 %v2530_v0  ;;  %v1087_v7 = vld [vmem:[#allocation2 + $0x520] sm:$0xff] }
 0x6e8   :  { %2287 = vmatpush3.msra.mxu1 %v1088_v6  ;;  %v1182_v6 = vld [vmem:[#allocation2 + $0x549] sm:$0x1] }
 0x6e9   :  { %v699_v9 = vmul.f32 0.125, %v698_v8  ;;  %2288 = vmatprep.subr.mxu1 %v2530_v0  ;;  %v1086_v8 = vld [vmem:[#allocation2 + $0x518] sm:$0xff] }
 0x6ea   :  { %2289 = vmatpush3.msra.mxu1 %v1087_v7 }
 0x6eb   :  { %v700_v10 = vsub.f32 %v689_v1, %v699_v9  ;;  %2290 = vmatprep.subr.mxu1 %v2530_v0 }
 0x6ec   :  { %2291 = vmatpush3.msra.mxu1 %v1086_v8 }
 0x6ed   :  { %v701_v11 = vmul.f32 %v700_v10, %v700_v10  ;;  %2292 = vmatprep.subr.mxu1 %v2530_v0  ;;  %v1084_v10 = vld [vmem:[#allocation2 + $0x508] sm:$0xff] }
 0x6ef   :  { %v702_v12 = vrot.slane %v701_v11, 4 }
 0x6f1   :  { %v703_v13 = vadd.f32 %v702_v12, %v701_v11 }
 0x6f3   :  { %v704_v14 = vrot.slane %v703_v13, 2 }
 0x6f5   :  { %v705_v15 = vadd.f32 %v704_v14, %v703_v13 }
 0x6f7   :  { %v706_v16 = vrot.slane %v705_v15, 1 }
 0x6f9   :  { %v707_v17 = vadd.f32 %v706_v16, %v705_v15  ;;  %v1083_v15 = vld [vmem:[#allocation2 + $0x500] sm:$0xff]  ;;  %v1082_v16 = vld [vmem:[#allocation2 + $0x4f8] sm:$0xff] }
 0x6fb   :  { %v708_v18 = vmul.f32 0.125, %v707_v17  ;;  %v1081_v17 = vld [vmem:[#allocation2 + $0x4f0] sm:$0xff] }
 0x6fc   :  { %v938_v19 = vpop.f32.mrf.mxu1 }
 0x6fd   :  { %v710_v20 = vadd.f32 1e-05, %v708_v18  ;;  %v942_v21 = vrot.slane %v938_v19, 4  ;;  %v1080_v18 = vld [vmem:[#allocation2 + $0x4e8] sm:$0xff] }
 0x6fe   :  { %v2244_v22 = vpop.f32.mrf.mxu1 }
 0x6ff   :  { %2474 = vrsqrt.f32 %v710_v20  ;;  %v943_v23 = vadd.f32 %v942_v21, %v938_v19  ;;  %v1078_v20 = vld [vmem:[#allocation2 + $0x4d8] sm:$0xff]  ;;  %v1077_v21 = vld [vmem:[#allocation2 + $0x4d0] sm:$0xff]  ;;  %v1076_v22 = vld [vmem:[#allocation2 + $0x4c8] sm:$0xff] }
 0x701   :  { %v944_v24 = vrot.slane %v943_v23, 2 }
 0x703   :  { %v945_v25 = vadd.f32 %v944_v24, %v943_v23 }
 0x705   :  { %v946_v26 = vrot.slane %v945_v25, 1 }
 0x707   :  { %v947_v27 = vadd.f32 %v946_v26, %v945_v25 }
 0x709   :  { %v948_v28 = vmul.f32 0.125, %v947_v27  ;;  %v1211_v27 = vld [vmem:[#allocation2 + $0x5c8] sm:$0xff] }
 0x70b   :  { %v949_v30 = vsub.f32 %v938_v19, %v948_v28 }
 0x70c   :  { %v2475_v31 = vpop.eup %2474 }
 0x70d   :  { %v712_v32 = vmul.f32 %v2475_v31, %v709_v29  ;;  %v950_v33 = vmul.f32 %v949_v30, %v949_v30  ;;  %v1209_v29 = vld [vmem:[#allocation2 + $0x5b8] sm:$0xff]  ;;  %v1208_v30 = vld [vmem:[#allocation2 + $0x5b0] sm:$0xff]  ;;  %v1207_v31 = vld [vmem:[#allocation2 + $0x5a8] sm:$0xff] }
 0x70f   :  { %v714_v35 = vmul.f32 %v712_v32, %v699_v9  ;;  %v719_v36 = vrot.slane %v712_v32, %v2593_v56  ;;  %v951_v37 = vrot.slane %v950_v33, 4  ;;  %v1085_v9 = vld [vmem:[#allocation2 + $0x510] sm:$0xff]  ;;  %v1206_v32 = vld [vmem:[#allocation2 + $0x5a0] sm:$0xff] }
 0x710   :  { %2293 = vmatpush3.msra.mxu1 %v1085_v9 }
 0x711   :  { %v715_v38 = vsub.f32 %v713_v34, %v714_v35  ;;  %v952_v39 = vadd.f32 %v951_v37, %v950_v33  ;;  %v720_v40 = vmul.f32 %v719_v36, %v689_v1  ;;  %2294 = vmatprep.subr.mxu1 %v2530_v0  ;;  %v1205_v33 = vld [vmem:[#allocation2 + $0x598] sm:$0xff]  ;;  %v1204_v34 = vld [vmem:[#allocation2 + $0x590] sm:$0xff]  ;;  %v1203_v35 = vld [vmem:[#allocation2 + $0x588] sm:$0xff] }
 0x712   :  { %2295 = vmatpush3.msra.mxu1 %v1084_v10  ;;  %v1202_v36 = vld [vmem:[#allocation2 + $0x580] sm:$0xff]  ;;  %v1201_v37 = vld [vmem:[#allocation2 + $0x578] sm:$0xff] }
 0x713   :  { %v724_v41 = vrot.slane %v715_v38, %v2593_v56  ;;  %v953_v42 = vrot.slane %v952_v39, 2  ;;  %2296 = vmatprep.subr.mxu1 %v2530_v0  ;;  %v1200_v38 = vld [vmem:[#allocation2 + $0x570] sm:$0xff] }
 0x714   :  { %2297 = vmatpush3.msra.mxu1 %v1083_v15  ;;  %v1458_v15 = vld [vmem:[#allocation2 + $0x6d0] sm:$0xff] }
 0x715   :  { %v725_v43 = vadd.f32 %v724_v41, %v720_v40  ;;  %v954_v44 = vadd.f32 %v953_v42, %v952_v39  ;;  %2298 = vmatprep.subr.mxu1 %v2530_v0  ;;  %v1199_v39 = vld [vmem:[#allocation2 + $0x568] sm:$0xff]  ;;  %v1198_v40 = vld [vmem:[#allocation2 + $0x560] sm:$0xff]  ;;  %v1197_v41 = vld [vmem:[#allocation2 + $0x558] sm:$0xff] }
 0x716   :  { %2299 = vmatpush3.msra.mxu1 %v1082_v16  ;;  %v1196_v42 = vld [vmem:[#allocation2 + $0x550] sm:$0xff]  ;;  %v2504_v16 = vld [vmem:[%s2858_s2 + $0x8] sm:$0xff] }
 0x717   :  { %v726_v45 = vmax.f32 %v725_v43, 0.0  ;;  %v955_v46 = vrot.slane %v954_v44, 1  ;;  %2300 = vmatprep.subr.mxu1 %v2530_v0  ;;  %v1459_v43 = vld [vmem:[#allocation2 + $0x6d8] sm:$0xff] }
 0x718   :  { %2301 = vmatpush3.msra.mxu1 %v1081_v17 }
 0x719   :  { %727 = vst [vmem:[%s2858_s2] sm:$0xff] %v726_v45  ;;  %v956_v47 = vadd.f32 %v955_v46, %v954_v44  ;;  %2302 = vmatprep.subr.mxu1 %v2530_v0 }
 0x71a   :  { %2303 = vmatpush3.msra.mxu1 %v1080_v18  ;;  %v1457_v18 = vld [vmem:[#allocation2 + $0x6c8] sm:$0xff] }
 0x71b   :  { %v957_v48 = vmul.f32 0.125, %v956_v47  ;;  %2304 = vmatprep.subr.mxu1 %v2530_v0 }
 0x71d   :  { %v959_v49 = vadd.f32 1e-05, %v957_v48 }
 0x71f   :  { %2476 = vrsqrt.f32 %v959_v49 }
 0x72c   :  { %v2477_v51 = vpop.eup %2476 }
 0x72d   :  { %v961_v52 = vmul.f32 %v2477_v51, %v958_v50 }
 0x72f   :  { %v963_v54 = vmul.f32 %v961_v52, %v948_v28  ;;  %v968_v55 = vrot.slane %v961_v52, %v2593_v56  ;;  %v1210_v28 = vld [vmem:[#allocation2 + $0x5c0] sm:$0xff] }
 0x731   :  { %v964_v57 = vsub.f32 %v962_v53, %v963_v54  ;;  %v969_v58 = vmul.f32 %v968_v55, %v938_v19  ;;  %v1079_v19 = vld [vmem:[#allocation2 + $0x4e0] sm:$0xff] }
 0x732   :  { %2305 = vmatpush3.msra.mxu1 %v1079_v19  ;;  %v1456_v19 = vld [vmem:[#allocation2 + $0x6c0] sm:$0xff] }
 0x733   :  { %v973_v59 = vrot.slane %v964_v57, %v2593_v56  ;;  %2306 = vmatprep.subr.mxu1 %v2530_v0 }
 0x734   :  { %2307 = vmatpush3.msra.mxu1 %v1078_v20  ;;  %v1455_v20 = vld [vmem:[#allocation2 + $0x6b8] sm:$0xff] }
 0x735   :  { %v974_v60 = vadd.f32 %v973_v59, %v969_v58  ;;  %2308 = vmatprep.subr.mxu1 %v2530_v0 }
 0x736   :  { %2309 = vmatpush3.msra.mxu1 %v1077_v21 }
 0x737   :  { %v975_v61 = vmax.f32 %v974_v60, 0.0  ;;  %2310 = vmatprep.subr.mxu1 %v2530_v0 }
 0x738   :  { %2311 = vmatpush3.msra.mxu1 %v1076_v22  ;;  %v1454_v22 = vld [vmem:[#allocation2 + $0x6b0] sm:$0xff] }
 0x739   :  { %2278 = vmatmul.mubr.f32.vlgmr.msra.gmra.mxu0 %v975_v61  ;;  %2350 = vmatprep.subr.mxu1 %v2530_v0 }
 0x73a   :  { %2347 = vmatprep.mubr.msk.f32.mxu0 %vm2531_vm0, %v2530_v0  ;;  %2316 = vmatpush3.msra.mxu0 %v1211_v27  ;;  %v1451_v27 = vld [vmem:[#allocation2 + $0x698] sm:$0xff] }
 0x73b   :  { %2317 = vmatprep.subr.mxu0 %v2530_v0 }
 0x73c   :  { %2318 = vmatpush3.msra.mxu0 %v1210_v28  ;;  %v1450_v28 = vld [vmem:[#allocation2 + $0x690] sm:$0xff] }
 0x73d   :  { %2319 = vmatprep.subr.mxu0 %v2530_v0 }
 0x73e   :  { %2320 = vmatpush3.msra.mxu0 %v1209_v29  ;;  %v1449_v29 = vld [vmem:[#allocation2 + $0x688] sm:$0xff] }
 0x73f   :  { %2321 = vmatprep.subr.mxu0 %v2530_v0 }
 0x740   :  { %2322 = vmatpush3.msra.mxu0 %v1208_v30  ;;  %v1448_v30 = vld [vmem:[#allocation2 + $0x680] sm:$0xff] }
 0x741   :  { %2323 = vmatprep.subr.mxu0 %v2530_v0 }
 0x742   :  { %2324 = vmatpush3.msra.mxu0 %v1207_v31  ;;  %v1447_v31 = vld [vmem:[#allocation2 + $0x678] sm:$0xff] }
 0x743   :  { %2325 = vmatprep.subr.mxu0 %v2530_v0 }
 0x744   :  { %2326 = vmatpush3.msra.mxu0 %v1206_v32  ;;  %v1446_v32 = vld [vmem:[#allocation2 + $0x670] sm:$0xff] }
 0x745   :  { %2327 = vmatprep.subr.mxu0 %v2530_v0 }
 0x746   :  { %2328 = vmatpush3.msra.mxu0 %v1205_v33  ;;  %v1445_v33 = vld [vmem:[#allocation2 + $0x668] sm:$0xff] }
 0x747   :  { %2329 = vmatprep.subr.mxu0 %v2530_v0 }
 0x748   :  { %2330 = vmatpush3.msra.mxu0 %v1204_v34 }
 0x749   :  { %2331 = vmatprep.subr.mxu0 %v2530_v0 }
 0x74a   :  { %2332 = vmatpush3.msra.mxu0 %v1203_v35  ;;  %v1444_v35 = vld [vmem:[#allocation2 + $0x660] sm:$0xff] }
 0x74b   :  { %2333 = vmatprep.subr.mxu0 %v2530_v0 }
 0x74c   :  { %2334 = vmatpush3.msra.mxu0 %v1202_v36 }
 0x74d   :  { %2335 = vmatprep.subr.mxu0 %v2530_v0 }
 0x74e   :  { %2336 = vmatpush3.msra.mxu0 %v1201_v37  ;;  %v1331_v37 = vld [vmem:[#allocation2 + $0x650] sm:$0xff] }
 0x74f   :  { %2337 = vmatprep.subr.mxu0 %v2530_v0 }
 0x750   :  { %2338 = vmatpush3.msra.mxu0 %v1200_v38  ;;  %v1330_v38 = vld [vmem:[#allocation2 + $0x648] sm:$0xff] }
 0x751   :  { %2339 = vmatprep.subr.mxu0 %v2530_v0 }
 0x752   :  { %2340 = vmatpush3.msra.mxu0 %v1199_v39  ;;  %v1329_v39 = vld [vmem:[#allocation2 + $0x640] sm:$0xff] }
 0x753   :  { %2341 = vmatprep.subr.mxu0 %v2530_v0 }
 0x754   :  { %2342 = vmatpush3.msra.mxu0 %v1198_v40  ;;  %v1328_v40 = vld [vmem:[#allocation2 + $0x638] sm:$0xff] }
 0x755   :  { %2343 = vmatprep.subr.mxu0 %v2530_v0 }
 0x756   :  { %2344 = vmatpush3.msra.mxu0 %v1197_v41  ;;  %v1327_v41 = vld [vmem:[#allocation2 + $0x630] sm:$0xff] }
 0x757   :  { %2345 = vmatprep.subr.mxu0 %v2530_v0 }
 0x758   :  { %2346 = vmatpush3.msra.mxu0 %v1196_v42  ;;  %v1325_v42 = vld [vmem:[#allocation2 + $0x620] sm:$0xff] }
 0x759   :  { %2385 = vmatprep.subr.mxu0 %v1459_v43 }
 0x7f9   :  { %v1063_v63 = vpop.f32.mrf.mxu0 }
 0x7fa   :  { %v1064_v1 = vadd.f32 %v1723_v62, %v1063_v63 }
 0x7fb   :  { %v2279_v2 = vpop.f32.mrf.mxu0 }
 0x7fc   :  { %1067 = vmax.xlane.f32.xlu1 %v1064_v1 }
 0x885   :  { %v1068_v11 = vpop.xlane.xlu1 %1067 }
 0x886   :  { %v1069_v12 = vsub.f32 %v1064_v1, %v1068_v11  ;;  %v731_v1 = vpop.xlane.xlu0 %730 }
 0x887   :  { %v732_v2 = vmax.f32 %v731_v1, 1e-24 }
 0x888   :  { %v1070_v13 = vmul.f32 1.442695, %v1069_v12 }
 0x88a   :  { %2478 = vpow2.f32 %v1070_v13 }
 0x897   :  { %v2479_v14 = vpop.eup %2478 }
 0x898   :  { %1072 = vadd.xlane.f32.xlu1 %v2479_v14 }
 0x921   :  { %v1073_v23 = vpop.xlane.xlu1 %1072 }
 0x922   :  { %2480 = vrcp.f32 %v1073_v23  ;;  %v1453_v23 = vld [vmem:[#allocation2 + $0x6a8] sm:$0xff] }
 0x92f   :  { %v2481_v24 = vpop.eup %2480 }
 0x930   :  { %v2768_v25 = vmul.f32 %v2481_v24, %v2479_v14 }
 0x932   :  { %2313 = vmatmul.mubr.f32.vlgmr.msra.gmra.mxu1 %v2768_v25  ;;  %1437 = vst [vmem:[%s2858_s2 + $0x20] sm:$0xff] %v2768_v25  ;;  %v1438_v26 = vmul.f32 %v2768_v25, %v2768_v25 }
 0x933   :  { %2382 = vmatprep.mubr.msk.f32.mxu1 %vm2531_vm0, %v2530_v0  ;;  %2351 = vmatpush3.msra.mxu1 %v1331_v37 }
 0x934   :  { %1439 = vadd.xlane.f32.xlu1 %v1438_v26  ;;  %v1452_v26 = vld [vmem:[#allocation2 + $0x6a0] sm:$0xff]  ;;  %2352 = vmatprep.subr.mxu1 %v2530_v0 }
 0x935   :  { %2353 = vmatpush3.msra.mxu1 %v1330_v38 }
 0x936   :  { %2354 = vmatprep.subr.mxu1 %v2530_v0 }
 0x937   :  { %2355 = vmatpush3.msra.mxu1 %v1329_v39 }
 0x938   :  { %2356 = vmatprep.subr.mxu1 %v2530_v0 }
 0x939   :  { %2357 = vmatpush3.msra.mxu1 %v1328_v40 }
 0x93a   :  { %2358 = vmatprep.subr.mxu1 %v2530_v0 }
 0x93b   :  { %2359 = vmatpush3.msra.mxu1 %v1327_v41 }
 0x93c   :  { %2360 = vmatprep.subr.mxu1 %v2530_v0 }
 0x9bd   :  { %v1440_v21 = vpop.xlane.xlu1 %1439 }
 0x9be   :  { %v1441_v24 = vmax.f32 %v1440_v21, 1e-24 }
 0x9f2   :  { %v1158_v44 = vpop.f32.mrf.mxu1 }
 0x9f3   :  { %v1162_v45 = vrot.slane %v1158_v44, 4 }
 0x9f4   :  { %v2314_v46 = vpop.f32.mrf.mxu1 }
 0x9f5   :  { %v1163_v47 = vadd.f32 %v1162_v45, %v1158_v44  ;;  %v1322_v45 = vld [vmem:[#allocation2 + $0x608] sm:$0xff]  ;;  %v1321_v46 = vld [vmem:[#allocation2 + $0x600] sm:$0xff] }
 0x9f7   :  { %v1164_v48 = vrot.slane %v1163_v47, 2 }
 0x9f9   :  { %v1165_v49 = vadd.f32 %v1164_v48, %v1163_v47  ;;  %v1320_v47 = vld [vmem:[#allocation2 + $0x5f8] sm:$0xff]  ;;  %v1319_v48 = vld [vmem:[#allocation2 + $0x5f0] sm:$0xff] }
 0x9fb   :  { %v1166_v50 = vrot.slane %v1165_v49, 1 }
 0x9fd   :  { %v1167_v51 = vadd.f32 %v1166_v50, %v1165_v49  ;;  %v1318_v49 = vld [vmem:[#allocation2 + $0x5e8] sm:$0xff]  ;;  %v1317_v50 = vld [vmem:[#allocation2 + $0x5e0] sm:$0xff] }
 0x9ff   :  { %v1168_v52 = vmul.f32 0.125, %v1167_v51  ;;  %v1316_v51 = vld [vmem:[#allocation2 + $0x5d8] sm:$0xff] }
 0xa01   :  { %v1169_v53 = vsub.f32 %v1158_v44, %v1168_v52 }
 0xa03   :  { %v1170_v54 = vmul.f32 %v1169_v53, %v1169_v53 }
 0xa05   :  { %v1171_v55 = vrot.slane %v1170_v54, 4 }
 0xa07   :  { %v1172_v57 = vadd.f32 %v1171_v55, %v1170_v54 }
 0xa09   :  { %v1173_v58 = vrot.slane %v1172_v57, 2 }
 0xa0b   :  { %v1174_v59 = vadd.f32 %v1173_v58, %v1172_v57 }
 0xa0d   :  { %v1175_v60 = vrot.slane %v1174_v59, 1 }
 0xa0f   :  { %v1176_v61 = vadd.f32 %v1175_v60, %v1174_v59 }
 0xa11   :  { %v1177_v62 = vmul.f32 0.125, %v1176_v61 }
 0xa13   :  { %v1179_v63 = vadd.f32 1e-05, %v1177_v62 }
 0xa15   :  { %2482 = vrsqrt.f32 %v1179_v63 }
 0xa16   :  { %2484 = vrsqrt.f32 %v732_v2 }
 0xa17   :  { %2486 = vrsqrt.f32 %v1441_v24  ;;  %v1298_v24 = vld [vmem:[#allocation2 + $0x5d0] sm:$0x1] }
 0xa22   :  { %v2483_v4 = vpop.eup %2482 }
 0xa23   :  { %v1181_v5 = vmul.f32 %v2483_v4, %v1178_v3  ;;  %v2485_v12 = vpop.eup %2484 }
 0xa24   :  { %v734_v17 = vmul.f32 %v2504_v16, %v2485_v12  ;;  %v2487_v34 = vpop.eup %2486 }
 0xa25   :  { %v1183_v7 = vmul.f32 %v1181_v5, %v1168_v52  ;;  %v1188_v8 = vrot.slane %v1181_v5, %v2593_v56  ;;  %v1443_v36 = vmul.f32 %v2487_v34, %v2768_v25  ;;  %v1326_v25 = vld [vmem:[#allocation2 + $0x628] sm:$0xff]  ;;  %v2815_v52 = vld [vmem:[#allocation2 + $0x760] sm:$0xff] }
 0xa26   :  { %2361 = vmatpush3.msra.mxu1 %v1326_v25 }
 0xa27   :  { %v1184_v9 = vsub.f32 %v1182_v6, %v1183_v7  ;;  %v1189_v10 = vmul.f32 %v1188_v8, %v1158_v44  ;;  %2362 = vmatprep.subr.mxu1 %v2530_v0  ;;  %v1323_v44 = vld [vmem:[#allocation2 + $0x610] sm:$0xff] }
 0xa28   :  { %2363 = vmatpush3.msra.mxu1 %v1325_v42 }
 0xa29   :  { %v1193_v11 = vrot.slane %v1184_v9, %v2593_v56  ;;  %2364 = vmatprep.subr.mxu1 %v2530_v0 }
 0xa2b   :  { %v1194_v13 = vadd.f32 %v1193_v11, %v1189_v10 }
 0xa2d   :  { %v1195_v14 = vmax.f32 %v1194_v13, 0.0 }
 0xa2f   :  { %2348 = vmatmul.mubr.f32.vlgmr.msra.gmra.mxu0 %v1195_v14 }
 0xa30   :  { %2386 = vmatpush3.msra.mxu0 %v1459_v43  ;;  %2417 = vmatprep.mubr.f32.mxu0 %v734_v17  ;;  %v1324_v43 = vld [vmem:[#allocation2 + $0x618] sm:$0xff] }
 0xa31   :  { %2387 = vmatprep.subr.mxu0 %v1458_v15  ;;  %2365 = vmatpush3.msra.mxu1 %v1324_v43 }
 0xa32   :  { %2388 = vmatpush3.msra.mxu0 %v1458_v15  ;;  %2366 = vmatprep.subr.mxu1 %v2530_v0 }
 0xa33   :  { %2389 = vmatprep.subr.mxu0 %v1457_v18  ;;  %2367 = vmatpush3.msra.mxu1 %v1323_v44 }
 0xa34   :  { %2390 = vmatpush3.msra.mxu0 %v1457_v18  ;;  %2368 = vmatprep.subr.mxu1 %v2530_v0 }
 0xa35   :  { %2391 = vmatprep.subr.mxu0 %v1456_v19  ;;  %2369 = vmatpush3.msra.mxu1 %v1322_v45 }
 0xa36   :  { %2392 = vmatpush3.msra.mxu0 %v1456_v19  ;;  %2370 = vmatprep.subr.mxu1 %v2530_v0 }
 0xa37   :  { %2393 = vmatprep.subr.mxu0 %v1455_v20  ;;  %2371 = vmatpush3.msra.mxu1 %v1321_v46 }
 0xa38   :  { %2394 = vmatpush3.msra.mxu0 %v1455_v20  ;;  %2372 = vmatprep.subr.mxu1 %v2530_v0 }
 0xa39   :  { %2395 = vmatprep.subr.mxu0 %v1454_v22  ;;  %2373 = vmatpush3.msra.mxu1 %v1320_v47 }
 0xa3a   :  { %2396 = vmatpush3.msra.mxu0 %v1454_v22  ;;  %2374 = vmatprep.subr.mxu1 %v2530_v0 }
 0xa3b   :  { %2397 = vmatprep.subr.mxu0 %v1453_v23  ;;  %2375 = vmatpush3.msra.mxu1 %v1319_v48 }
 0xa3c   :  { %2398 = vmatpush3.msra.mxu0 %v1453_v23  ;;  %2376 = vmatprep.subr.mxu1 %v2530_v0 }
 0xa3d   :  { %2399 = vmatprep.subr.mxu0 %v1452_v26  ;;  %2377 = vmatpush3.msra.mxu1 %v1318_v49  ;;  %v1615_v49 = vld [vmem:[#allocation2 + $0x758] sm:$0xff] }
 0xa3e   :  { %2400 = vmatpush3.msra.mxu0 %v1452_v26  ;;  %2378 = vmatprep.subr.mxu1 %v2530_v0 }
 0xa3f   :  { %2401 = vmatprep.subr.mxu0 %v1451_v27  ;;  %2379 = vmatpush3.msra.mxu1 %v1317_v50 }
 0xa40   :  { %2402 = vmatpush3.msra.mxu0 %v1451_v27  ;;  %2380 = vmatprep.subr.mxu1 %v2530_v0 }
 0xa41   :  { %2403 = vmatprep.subr.mxu0 %v1450_v28  ;;  %2381 = vmatpush3.msra.mxu1 %v1316_v51 }
 0xa42   :  { %2404 = vmatpush3.msra.mxu0 %v1450_v28  ;;  %2420 = vmatprep.subr.mxu1 %v2815_v52 }
 0xa43   :  { %2405 = vmatprep.subr.mxu0 %v1449_v29 }
 0xa44   :  { %2406 = vmatpush3.msra.mxu0 %v1449_v29 }
 0xa45   :  { %2407 = vmatprep.subr.mxu0 %v1448_v30 }
 0xa46   :  { %2408 = vmatpush3.msra.mxu0 %v1448_v30 }
 0xa47   :  { %2409 = vmatprep.subr.mxu0 %v1447_v31 }
 0xa48   :  { %2410 = vmatpush3.msra.mxu0 %v1447_v31 }
 0xa49   :  { %2411 = vmatprep.subr.mxu0 %v1446_v32 }
 0xa4a   :  { %2412 = vmatpush3.msra.mxu0 %v1446_v32  ;;  %v1302_v32 = vld [vmem:[#allocation2 + $0x5d1] sm:$0x1] }
 0xa4b   :  { %2413 = vmatprep.subr.mxu0 %v1445_v33 }
 0xa4c   :  { %2414 = vmatpush3.msra.mxu0 %v1445_v33 }
 0xa4d   :  { %2415 = vmatprep.subr.mxu0 %v1444_v35 }
 0xa4e   :  { %2416 = vmatpush3.msra.mxu0 %v1444_v35 }
 0xa4f   :  { %2418 = vmatmul.mubr.f32.vlgmr.msra.gmra.mxu0 %v1443_v36 }
 0xaef   :  { %v1278_v53 = vpop.f32.mrf.mxu0 }
 0xaf0   :  { %v1282_v54 = vrot.slane %v1278_v53, 4 }
 0xaf1   :  { %v2349_v55 = vpop.f32.mrf.mxu0 }
 0xaf2   :  { %v1283_v57 = vadd.f32 %v1282_v54, %v1278_v53  ;;  %v1614_v54 = vld [vmem:[#allocation2 + $0x750] sm:$0xff] }
 0xaf4   :  { %v1284_v58 = vrot.slane %v1283_v57, 2 }
 0xaf6   :  { %v1285_v59 = vadd.f32 %v1284_v58, %v1283_v57 }
 0xaf8   :  { %v1286_v60 = vrot.slane %v1285_v59, 1 }
 0xafa   :  { %v1287_v61 = vadd.f32 %v1286_v60, %v1285_v59  ;;  %v1612_v60 = vld [vmem:[#allocation2 + $0x740] sm:$0xff] }
 0xafc   :  { %v1288_v62 = vmul.f32 0.125, %v1287_v61 }
 0xafe   :  { %v1289_v63 = vsub.f32 %v1278_v53, %v1288_v62 }
 0xb00   :  { %v1290_v1 = vmul.f32 %v1289_v63, %v1289_v63  ;;  %v1609_v63 = vld [vmem:[#allocation2 + $0x728] sm:$0xff] }
 0xb02   :  { %v1291_v2 = vrot.slane %v1290_v1, 4 }
 0xb04   :  { %v1292_v3 = vadd.f32 %v1291_v2, %v1290_v1  ;;  %v1608_v1 = vld [vmem:[#allocation2 + $0x720] sm:$0xff]  ;;  %v1607_v2 = vld [vmem:[#allocation2 + $0x718] sm:$0xff] }
 0xb06   :  { %v1293_v0 = vrot.slane %v1292_v3, 2 }
 0xb08   :  { %v1294_v4 = vadd.f32 %v1293_v0, %v1292_v3  ;;  %v1535_v3 = vld [vmem:[#allocation2 + $0x6e0] sm:$0x1]  ;;  %v1606_v0 = vld [vmem:[#allocation2 + $0x710] sm:$0xff] }
 0xb0a   :  { %v1295_v5 = vrot.slane %v1294_v4, 1 }
 0xb0c   :  { %v1296_v6 = vadd.f32 %v1295_v5, %v1294_v4  ;;  %v1605_v5 = vld [vmem:[#allocation2 + $0x708] sm:$0xff] }
 0xb0e   :  { %v1297_v7 = vmul.f32 0.125, %v1296_v6 }
 0xb0f   :  { %v2818_v8 = vpop.f32.mrf.mxu0 }
 0xb10   :  { %v1299_v9 = vadd.f32 1e-05, %v1297_v7  ;;  %v1569_v10 = vrot.slane %v2818_v8, 4 }
 0xb11   :  { %v2821_v11 = vpop.f32.mrf.mxu0 }
 0xb12   :  { %2488 = vrsqrt.f32 %v1299_v9  ;;  %v1570_v12 = vadd.f32 %v2818_v8, %v1569_v10  ;;  %v1537_v13 = vrot.slane %v2821_v11, 4  ;;  %v1536_v9 = vld [vmem:[#allocation2 + $0x6e1] sm:$0x1] }
 0xb13   :  { %v1604_v10 = vld [vmem:[#allocation2 + $0x700] sm:$0xff] }
 0xb14   :  { %v1571_v14 = vrot.slane %v1570_v12, 2  ;;  %v1538_v15 = vadd.f32 %v1537_v13, %v2821_v11 }
 0xb16   :  { %v1572_v16 = vadd.f32 %v1571_v14, %v1570_v12  ;;  %v1539_v17 = vrot.slane %v1538_v15, 2 }
 0xb18   :  { %v1573_v18 = vrot.slane %v1572_v16, 1  ;;  %v1540_v19 = vadd.f32 %v1539_v17, %v1538_v15  ;;  %v1603_v15 = vld [vmem:[#allocation2 + $0x6f8] sm:$0xff] }
 0xb1a   :  { %v1574_v20 = vadd.f32 %v1573_v18, %v1572_v16  ;;  %v1541_v21 = vrot.slane %v1540_v19, 1 }
 0xb1c   :  { %v2826_v22 = vmul.f32 0.125, %v1574_v20  ;;  %v1542_v23 = vadd.f32 %v1541_v21, %v1540_v19  ;;  %v1602_v19 = vld [vmem:[#allocation2 + $0x6f0] sm:$0xff] }
 0xb1e   :  { %v1576_v26 = vsub.f32 %v2818_v8, %v2826_v22  ;;  %v2830_v27 = vmul.f32 0.125, %v1542_v23  ;;  %v1601_v23 = vld [vmem:[#allocation2 + $0x6e8] sm:$0xff] }
 0xb1f   :  { %v2489_v28 = vpop.eup %2488 }
 0xb20   :  { %v1301_v29 = vmul.f32 %v2489_v28, %v1298_v24  ;;  %v1577_v30 = vmul.f32 %v1576_v26, %v1576_v26  ;;  %v1544_v31 = vsub.f32 %v2821_v11, %v2830_v27 }
 0xb22   :  { %v1303_v33 = vmul.f32 %v1301_v29, %v1288_v62  ;;  %v1308_v34 = vrot.slane %v1301_v29, %v2593_v56  ;;  %v1578_v35 = vrot.slane %v1577_v30, 4  ;;  %v1545_v36 = vmul.f32 %v1544_v31, %v1544_v31  ;;  %v1611_v62 = vld [vmem:[#allocation2 + $0x738] sm:$0xff] }
 0xb24   :  { %v1304_v37 = vsub.f32 %v1302_v32, %v1303_v33  ;;  %v1579_v38 = vadd.f32 %v1578_v35, %v1577_v30  ;;  %v1546_v39 = vrot.slane %v1545_v36, 4  ;;  %v1309_v40 = vmul.f32 %v1308_v34, %v1278_v53  ;;  %v1613_v53 = vld [vmem:[#allocation2 + $0x748] sm:$0xff] }
 0xb26   :  { %v1313_v41 = vrot.slane %v1304_v37, %v2593_v56  ;;  %v1580_v25 = vrot.slane %v1579_v38, 2  ;;  %v1547_v42 = vadd.f32 %v1546_v39, %v1545_v36 }
 0xb28   :  { %v1314_v43 = vadd.f32 %v1313_v41, %v1309_v40  ;;  %v1581_v44 = vadd.f32 %v1580_v25, %v1579_v38  ;;  %v1548_v45 = vrot.slane %v1547_v42, 2 }
 0xb2a   :  { %v1582_v46 = vrot.slane %v1581_v44, 1  ;;  %v1549_v47 = vadd.f32 %v1548_v45, %v1547_v42  ;;  %v1315_v48 = vmax.f32 %v1314_v43, 0.0 }
 0xb2c   :  { %v1583_v50 = vadd.f32 %v1582_v46, %v1581_v44  ;;  %v1550_v51 = vrot.slane %v1549_v47, 1  ;;  %2383 = vmatmul.mubr.f32.vlgmr.msra.gmra.mxu1 %v1315_v48 }
 0xb2d   :  { %2421 = vmatpush3.msra.mxu1 %v2815_v52  ;;  %v1610_v52 = vld [vmem:[#allocation2 + $0x730] sm:$0xff] }
 0xb2e   :  { %v1584_v55 = vmul.f32 0.125, %v1583_v50  ;;  %v1551_v57 = vadd.f32 %v1550_v51, %v1549_v47  ;;  %2422 = vmatprep.subr.mxu1 %v1615_v49  ;;  %v1724_v47 = vld [vmem:[#allocation2 + $0x768] ss:$0 sm:$0xff] }
 0xb2f   :  { %2423 = vmatpush3.msra.mxu1 %v1615_v49 }
 0xb30   :  { %v1585_v58 = vadd.f32 1e-05, %v1584_v55  ;;  %v1552_v59 = vmul.f32 0.125, %v1551_v57  ;;  %2424 = vmatprep.subr.mxu1 %v1614_v54 }
 0xb31   :  { %2425 = vmatpush3.msra.mxu1 %v1614_v54  ;;  %v1418_v54 = vld [vmem:[#allocation2 + $0x658] sm:$0x1] }
 0xb32   :  { %2490 = vrsqrt.f32 %v1585_v58  ;;  %v1553_v61 = vadd.f32 1e-05, %v1552_v59  ;;  %2426 = vmatprep.subr.mxu1 %v1613_v53 }
 0xb33   :  { %2427 = vmatpush3.msra.mxu1 %v1613_v53  ;;  %v1422_v53 = vld [vmem:[#allocation2 + $0x659] sm:$0x1] }
 0xb34   :  { %2492 = vrsqrt.f32 %v1553_v61  ;;  %2428 = vmatprep.subr.mxu1 %v1612_v60 }
 0xb35   :  { %2429 = vmatpush3.msra.mxu1 %v1612_v60 }
 0xb36   :  { %2430 = vmatprep.subr.mxu1 %v1611_v62 }
 0xb37   :  { %2431 = vmatpush3.msra.mxu1 %v1611_v62 }
 0xb38   :  { %2432 = vmatprep.subr.mxu1 %v1610_v52 }
 0xb39   :  { %2433 = vmatpush3.msra.mxu1 %v1610_v52 }
 0xb3a   :  { %2434 = vmatprep.subr.mxu1 %v1609_v63 }
 0xb3b   :  { %2435 = vmatpush3.msra.mxu1 %v1609_v63 }
 0xb3c   :  { %2436 = vmatprep.subr.mxu1 %v1608_v1 }
 0xb3d   :  { %2437 = vmatpush3.msra.mxu1 %v1608_v1 }
 0xb3e   :  { %2438 = vmatprep.subr.mxu1 %v1607_v2 }
 0xb3f   :  { %v2491_v4 = vpop.eup %2490  ;;  %2439 = vmatpush3.msra.mxu1 %v1607_v2 }
 0xb40   :  { %v1587_v6 = vmul.f32 %v2491_v4, %v1535_v3  ;;  %2440 = vmatprep.subr.mxu1 %v1606_v0 }
 0xb41   :  { %v2493_v7 = vpop.eup %2492  ;;  %2441 = vmatpush3.msra.mxu1 %v1606_v0 }
 0xb42   :  { %v1588_v12 = vmul.f32 %v1587_v6, %v2826_v22  ;;  %v1555_v13 = vmul.f32 %v2493_v7, %v1535_v3  ;;  %2442 = vmatprep.subr.mxu1 %v1605_v5  ;;  %v1593_v14 = vrot.slane %v1587_v6, %v2593_v56 }
 0xb43   :  { %2443 = vmatpush3.msra.mxu1 %v1605_v5 }
 0xb44   :  { %v1589_v16 = vsub.f32 %v1536_v9, %v1588_v12  ;;  %v1556_v17 = vmul.f32 %v1555_v13, %v2830_v27  ;;  %v1561_v18 = vrot.slane %v1555_v13, %v2593_v56  ;;  %2444 = vmatprep.subr.mxu1 %v1604_v10  ;;  %v1594_v22 = vmul.f32 %v2818_v8, %v1593_v14 }
 0xb45   :  { %2445 = vmatpush3.msra.mxu1 %v1604_v10 }
 0xb46   :  { %v1598_v20 = vrot.slane %v1589_v16, %v2593_v56  ;;  %2446 = vmatprep.subr.mxu1 %v1603_v15  ;;  %v1557_v21 = vsub.f32 %v1536_v9, %v1556_v17  ;;  %v1562_v24 = vmul.f32 %v1561_v18, %v2821_v11 }
 0xb47   :  { %2447 = vmatpush3.msra.mxu1 %v1603_v15 }
 0xb48   :  { %2448 = vmatprep.subr.mxu1 %v1602_v19  ;;  %v1566_v26 = vrot.slane %v1557_v21, %v2593_v56  ;;  %v1599_v28 = vadd.f32 %v1598_v20, %v1594_v22 }
 0xb49   :  { %2449 = vmatpush3.msra.mxu1 %v1602_v19 }
 0xb4a   :  { %2450 = vmatprep.subr.mxu1 %v1601_v23  ;;  %v1567_v27 = vadd.f32 %v1566_v26, %v1562_v24  ;;  %v1600_v30 = vmax.f32 %v1599_v28, 0.0 }
 0xb4b   :  { %2451 = vmatpush3.msra.mxu1 %v1601_v23 }
 0xb4c   :  { %v1568_v29 = vmax.f32 %v1567_v27, 0.0 }
 0xb4e   :  { %2452 = vmatprep.mubr.f32.mxu1 %v1568_v29 }
 0xb4f   :  { %2453 = vmatmul.mubr.f32.vlgmr.msra.gmra.mxu1 %v1600_v30 }
 0xbec   :  { %v1398_v31 = vpop.f32.mrf.mxu1 }
 0xbed   :  { %v1402_v32 = vrot.slane %v1398_v31, 4 }
 0xbee   :  { %v2384_v33 = vpop.f32.mrf.mxu1 }
 0xbef   :  { %v1403_v8 = vadd.f32 %v1402_v32, %v1398_v31 }
 0xbf1   :  { %v1404_v34 = vrot.slane %v1403_v8, 2 }
 0xbf3   :  { %v1405_v35 = vadd.f32 %v1404_v34, %v1403_v8 }
 0xbf5   :  { %v1406_v36 = vrot.slane %v1405_v35, 1 }
 0xbf7   :  { %v1407_v11 = vadd.f32 %v1406_v36, %v1405_v35 }
 0xbf9   :  { %v1408_v37 = vmul.f32 0.125, %v1407_v11 }
 0xbfb   :  { %v1409_v38 = vsub.f32 %v1398_v31, %v1408_v37 }
 0xbfd   :  { %v1410_v39 = vmul.f32 %v1409_v38, %v1409_v38 }
 0xbff   :  { %v1411_v40 = vrot.slane %v1410_v39, 4 }
 0xc01   :  { %v1412_v41 = vadd.f32 %v1411_v40, %v1410_v39 }
 0xc03   :  { %v1413_v25 = vrot.slane %v1412_v41, 2 }
 0xc05   :  { %v1414_v42 = vadd.f32 %v1413_v25, %v1412_v41 }
 0xc07   :  { %v1415_v43 = vrot.slane %v1414_v42, 1 }
 0xc09   :  { %v1416_v44 = vadd.f32 %v1415_v43, %v1414_v42 }
 0xc0b   :  { %v1417_v45 = vmul.f32 0.125, %v1416_v44 }
 0xc0d   :  { %v1419_v46 = vadd.f32 1e-05, %v1417_v45 }
 0xc0f   :  { %2494 = vrsqrt.f32 %v1419_v46  ;;  %v2454_v48 = vpop.f32.mrf.mxu1 }
 0xc10   :  { %v1694_v49 = vadd.f32 %v2454_v48, %v1724_v47 }
 0xc11   :  { %v1688_v50 = vpop.f32.mrf.mxu1 }
 0xc12   :  { %v1689_v51 = vadd.f32 %v1724_v47, %v1688_v50  ;;  %1699 = vmax.xlane.f32.xlu1 %v1694_v49 }
 0xc14   :  { %1697 = vmax.xlane.f32.xlu0 %v1689_v51 }
 0xc1c   :  { %v2495_v55 = vpop.eup %2494 }
 0xc1d   :  { %v1421_v57 = vmul.f32 %v2495_v55, %v1418_v54 }
 0xc1f   :  { %v1423_v58 = vmul.f32 %v1421_v57, %v1408_v37  ;;  %v1428_v59 = vrot.slane %v1421_v57, %v2593_v56 }
 0xc21   :  { %v1424_v60 = vsub.f32 %v1422_v53, %v1423_v58  ;;  %v1429_v61 = vmul.f32 %v1428_v59, %v1398_v31 }
 0xc23   :  { %v1433_v62 = vrot.slane %v1424_v60, %v2593_v56 }
 0xc25   :  { %v1434_v52 = vadd.f32 %v1433_v62, %v1429_v61 }
 0xc27   :  { %v1435_v63 = vmax.f32 %v1434_v52, 0.0 }
 0xc29   :  { %1436 = vst [vmem:[%s2858_s2 + $0x18] sm:$0xff] %v1435_v63 }
 0xc9b   :  { %v1700_v1 = vpop.xlane.xlu1 %1699 }
 0xc9c   :  { %v1702_v2 = vsub.f32 %v1694_v49, %v1700_v1 }
 0xc9d   :  { %v1698_v3 = vpop.xlane.xlu0 %1697 }
 0xc9e   :  { %v1705_v0 = vmul.f32 1.442695, %v1702_v2  ;;  %v1701_v4 = vsub.f32 %v1689_v51, %v1698_v3 }
 0xca0   :  { %2496 = vpow2.f32 %v1705_v0  ;;  %v1703_v5 = vmul.f32 1.442695, %v1701_v4 }
 0xca2   :  { %2498 = vpow2.f32 %v1703_v5 }
 0xcad   :  { %v2497_v6 = vpop.eup %2496 }
 0xcae   :  { %1709 = vadd.xlane.f32.xlu1 %v2497_v6 }
 0xcaf   :  { %v2499_v7 = vpop.eup %2498 }
 0xcb0   :  { %1707 = vadd.xlane.f32.xlu0 %v2499_v7 }
 0xd37   :  { %v1710_v9 = vpop.xlane.xlu1 %1709 }
 0xd38   :  { %2500 = vrcp.f32 %v1710_v9 }
 0xd39   :  { %v1708_v56 = vpop.xlane.xlu0 %1707 }
 0xd3a   :  { %2502 = vrcp.f32 %v1708_v56 }
 0xd45   :  { %v2501_v10 = vpop.eup %2500 }
 0xd46   :  { %v1714_v12 = vmul.f32 %v2501_v10, %v2497_v6 }
 0xd47   :  { %v2503_v13 = vpop.eup %2502 }
 0xd48   :  { %1716 = vst [vmem:[%s2858_s2 + $0x28] sm:$0xff] %v1714_v12  ;;  %v1712_v14 = vmul.f32 %v2503_v13, %v2499_v7 }
 0xd4a   :  { %1715 = vst [vmem:[%s2858_s2 + $0x10] sm:$0xff] %v1712_v14 }
 0xd4b   :  { %1721 = vsyncpa [#allocation3], 1 }

</bundles_post_ra>
